<compile_context>
chip_gen: v5e
topology: v5e:2x2
jax: 0.10.0
libtpu: 0.0.40
codegen_flags: <defaults>
</compile_context>

<pallas_src>
import functools
import math

import jax
import jax.numpy as jnp
from jax import lax
from jax.experimental import pallas as pl
from jax.experimental.pallas import tpu as pltpu

_MXU_DTYPE = jnp.bfloat16   # MXU input dtype (accumulation stays f32)
_LN_EPS = 1e-5
_NEG_INF = -1000000.0       # matches masked_fill(mask, -1e6) in the reference


# ---------------------------------------------------------------------------
# In-kernel helpers (operate on values / scratch refs)
# ---------------------------------------------------------------------------

def _layernorm_f32(x, g, b):
    mean = jnp.mean(x, axis=-1, keepdims=True)
    xc = x - mean
    var = jnp.mean(xc * xc, axis=-1, keepdims=True)   # biased var (torch LN)
    return xc * lax.rsqrt(var + _LN_EPS) * g + b


def _mha_into_scratch(q, k, v, scr_ref, num_heads, dim_attention, causal):
    """q:(Sq,D), k,v:(Sk,D) f32; softmax scale already folded into q.

    Writes each head's attention output into its lane slice of scr_ref (Sq,D);
    the (single, full-depth) output projection is applied by the caller.
    """
    Sq = q.shape[0]
    Sk = k.shape[0]
    if causal:
        row = lax.broadcasted_iota(jnp.int32, (Sq, Sk), 0)
        col = lax.broadcasted_iota(jnp.int32, (Sq, Sk), 1)
        mask = col > row                               # == triu(ones, k=1)
    # TODO(synk): for large num_heads use lax.fori_loop(unroll=True) instead
    for h in range(num_heads):                         # static unrolled loop
        sl = slice(h * dim_attention, (h + 1) * dim_attention)
        qh = q[:, sl].astype(_MXU_DTYPE)
        kh = k[:, sl].astype(_MXU_DTYPE)
        vh = v[:, sl].astype(_MXU_DTYPE)
        # "qd,kd->qk": contract last dims of both -> no explicit K transpose
        s = lax.dot_general(qh, kh, (((1,), (1,)), ((), ())),
                            preferred_element_type=jnp.float32)
        if causal:
            s = jnp.where(mask, _NEG_INF, s)
        s = s - jnp.max(s, axis=-1, keepdims=True)     # stable softmax (f32)
        p = jnp.exp(s)
        p = p * pl.reciprocal(jnp.sum(p, axis=-1, keepdims=True), approx=True)
        scr_ref[:, sl] = jnp.dot(p.astype(_MXU_DTYPE), vh,
                                 preferred_element_type=jnp.float32)


# ---------------------------------------------------------------------------
# Fused decoder-cell kernel (self-attn block -> cross-attn block -> FFN block)
# ---------------------------------------------------------------------------

def _decoder_cell_kernel(x_ref, enc_ref,
                         ln1_g, ln1_b, wqkv_s, bqkv_s, wo_s, bo_s,
                         ln2_g, ln2_b, wq_c, bq_c, wkv_c, bkv_c, wo_c, bo_c,
                         ln3_g, ln3_b, w1, b1, w2, b2,
                         o_ref, attn_scr,
                         *, num_heads, dim_attention, causal):
    D = num_heads * dim_attention
    x = x_ref[0]                                       # (S, D) f32 residual

    # --- self-attention block: res1 = x + W_o(MHA(LN1(x), causal)) + b_o ---
    x_ln = _layernorm_f32(x, ln1_g[...], ln1_b[...])
    qkv = jnp.dot(x_ln.astype(_MXU_DTYPE), wqkv_s[...],
                  preferred_element_type=jnp.float32) + bqkv_s[...]
    _mha_into_scratch(qkv[:, :D], qkv[:, D:2 * D], qkv[:, 2 * D:], attn_scr,
                      num_heads, dim_attention, causal=causal)
    attn = jnp.dot(attn_scr[...].astype(_MXU_DTYPE), wo_s[...],
                   preferred_element_type=jnp.float32)
    res1 = x + attn + bo_s[...]

    # --- cross-attention block: res2 = res1 + W_o(MHA(LN2(res1), enc)) + b_o
    r_ln = _layernorm_f32(res1, ln2_g[...], ln2_b[...])
    q = jnp.dot(r_ln.astype(_MXU_DTYPE), wq_c[...],
                preferred_element_type=jnp.float32) + bq_c[...]
    enc = enc_ref[0].astype(_MXU_DTYPE)                # enc outputs (no LN)
    kv = jnp.dot(enc, wkv_c[...],
                 preferred_element_type=jnp.float32) + bkv_c[...]
    _mha_into_scratch(q, kv[:, :D], kv[:, D:], attn_scr,
                      num_heads, dim_attention, causal=False)
    attn2 = jnp.dot(attn_scr[...].astype(_MXU_DTYPE), wo_c[...],
                    preferred_element_type=jnp.float32)
    res2 = res1 + attn2 + bo_c[...]

    # --- FFN block: out = res2 + W2(relu(W1(LN3(res2)) + b1)) + b2 ---------
    f_ln = _layernorm_f32(res2, ln3_g[...], ln3_b[...])
    h = jnp.dot(f_ln.astype(_MXU_DTYPE), w1[...],
                preferred_element_type=jnp.float32) + b1[...]
    h = jnp.maximum(h, 0.0)
    y = jnp.dot(h.astype(_MXU_DTYPE), w2[...],
                preferred_element_type=jnp.float32) + b2[...]
    o_ref[0] = res2 + y


# ---------------------------------------------------------------------------
# pallas_call wrapper
# ---------------------------------------------------------------------------

def transformer_decoder_cell(fp, X, enc_outputs, num_heads, dim_attention,
                             causal_self_mask=True):
    """fp: pre-fused / pre-cast params from prepare_fused_params (built once)."""
    B, S, D = X.shape
    Sk = enc_outputs.shape[1]
    H4 = fp["w1"].shape[1]
    Da = dim_attention

    kernel = functools.partial(_decoder_cell_kernel, num_heads=num_heads,
                               dim_attention=Da, causal=causal_self_mask)

    # Constant-index weights/biases: single-buffered (no point double-buffering
    # blocks whose index_map never changes).
    def _w(shape):
        return pl.BlockSpec(shape, lambda b: (0, 0),
                            pipeline_mode=pl.Buffered(1))

    in_specs = [
        pl.BlockSpec((1, S, D), lambda b: (b, 0, 0)),            # X
        pl.BlockSpec((1, Sk, D), lambda b: (b, 0, 0)),           # enc_outputs
        _w((1, D)), _w((1, D)),                                  # ln1 g/b
        _w((D, 3 * D)), _w((1, 3 * D)), _w((D, D)), _w((1, D)),  # self-attn
        _w((1, D)), _w((1, D)),                                  # ln2 g/b
        _w((D, D)), _w((1, D)), _w((D, 2 * D)), _w((1, 2 * D)),  # cross q/kv
        _w((D, D)), _w((1, D)),                                  # cross W_o/b_o
        _w((1, D)), _w((1, D)),                                  # ln3 g/b
        _w((D, H4)), _w((1, H4)), _w((H4, D)), _w((1, D)),       # FFN
    ]

    # Advisory cost hint for the XLA scheduler.
    flops = B * (2 * S * D * 3 * D + 4 * num_heads * S * S * Da
                 + 2 * S * D * D                     # self W_o
                 + 2 * S * D * D + 2 * Sk * D * 2 * D
                 + 4 * num_heads * S * Sk * Da + 2 * S * D * D
                 + 4 * S * D * H4)
    transc = B * num_heads * (S * S + S * Sk)
    w_bytes = sum(int(v.size) * v.dtype.itemsize for v in fp.values())
    bytes_acc = 8 * B * S * D + 4 * B * Sk * D + w_bytes
    cost = pl.CostEstimate(flops=int(flops), transcendentals=int(transc),
                           bytes_accessed=int(bytes_acc))

    # Explicit VMEM budget: single-buffered weights + double-buffered
    # activations + in-kernel temporaries, >= 32 MiB, capped below v7x's
    # 64 MiB physical VMEM.
    act_bytes = 4 * (2 * S * D + 2 * Sk * D + 2 * S * D + S * D)
    tmp_bytes = 4 * (S * 3 * D + Sk * 2 * D + S * S + S * H4)
    vmem_limit = int(min(max(2 * (w_bytes + act_bytes + tmp_bytes), 32 << 20),
                         48 << 20))

    return pl.pallas_call(
        kernel,
        out_shape=jax.ShapeDtypeStruct((B, S, D), jnp.float32),
        grid=(B,),
        in_specs=in_specs,
        out_specs=pl.BlockSpec((1, S, D), lambda b: (b, 0, 0)),
        scratch_shapes=[pltpu.VMEM((S, D), jnp.float32)],    # attn head slab
        compiler_params=pltpu.CompilerParams(
            dimension_semantics=("parallel",),
            vmem_limit_bytes=vmem_limit),
        cost_estimate=cost,
    )(X, enc_outputs,
      fp["ln1_g"], fp["ln1_b"], fp["wqkv_s"], fp["bqkv_s"], fp["wo_s"], fp["bo_s"],
      fp["ln2_g"], fp["ln2_b"], fp["wq_c"], fp["bq_c"], fp["wkv_c"], fp["bkv_c"],
      fp["wo_c"], fp["bo_c"],
      fp["ln3_g"], fp["ln3_b"], fp["w1"], fp["b1"], fp["w2"], fp["b2"])


# ---------------------------------------------------------------------------
# One-time parameter preparation (fuse + fold scale + cast) -- NOT per call
# ---------------------------------------------------------------------------

def prepare_fused_params(params, dim_attention):
    D = params["ln1_g"].shape[0]
    scale = 1.0 / math.sqrt(dim_attention)
    sa, ca = params["self_attn"], params["cross_attn"]
    return {
        "ln1_g": params["ln1_g"].reshape(1, D),
        "ln1_b": params["ln1_b"].reshape(1, D),
        "ln2_g": params["ln2_g"].reshape(1, D),
        "ln2_b": params["ln2_b"].reshape(1, D),
        "ln3_g": params["ln3_g"].reshape(1, D),
        "ln3_b": params["ln3_b"].reshape(1, D),
        # self-attention: fused QKV, softmax scale folded into the Q columns
        "wqkv_s": jnp.concatenate([sa["wq"] * scale, sa["wk"], sa["wv"]],
                                  axis=1).astype(_MXU_DTYPE),
        "bqkv_s": jnp.concatenate([sa["bq"] * scale, sa["bk"],
                                   sa["bv"]]).reshape(1, 3 * D),
        "wo_s": sa["wo"].astype(_MXU_DTYPE),
        "bo_s": sa["bo"].reshape(1, D),
        # cross-attention: separate Q and fused KV (different input tensors)
        "wq_c": (ca["wq"] * scale).astype(_MXU_DTYPE),
        "bq_c": (ca["bq"] * scale).reshape(1, D),
        "wkv_c": jnp.concatenate([ca["wk"], ca["wv"]],
                                 axis=1).astype(_MXU_DTYPE),
        "bkv_c": jnp.concatenate([ca["bk"], ca["bv"]]).reshape(1, 2 * D),
        "wo_c": ca["wo"].astype(_MXU_DTYPE),
        "bo_c": ca["bo"].reshape(1, D),
        # FFN
        "w1": params["ffn_w1"].astype(_MXU_DTYPE),
        "b1": params["ffn_b1"].reshape(1, 4 * D),
        "w2": params["ffn_w2"].astype(_MXU_DTYPE),
        "b2": params["ffn_b2"].reshape(1, D),
    }


# ---------------------------------------------------------------------------
# Deterministic parameter init (shapes from the PyTorch __init__)
# ---------------------------------------------------------------------------

def _init_linear(key, din, dout):
    k1, k2 = jax.random.split(key)
    bound = 1.0 / math.sqrt(din)
    w = jax.random.uniform(k1, (din, dout), jnp.float32, -bound, bound)
    b = jax.random.uniform(k2, (dout,), jnp.float32, -bound, bound)
    return w, b


def _init_mha(key, dim_input):
    ks = jax.random.split(key, 4)
    wq, bq = _init_linear(ks[0], dim_input, dim_input)
    wk, bk = _init_linear(ks[1], dim_input, dim_input)
    wv, bv = _init_linear(ks[2], dim_input, dim_input)
    wo, bo = _init_linear(ks[3], dim_input, dim_input)
    return dict(wq=wq, bq=bq, wk=wk, bk=bk, wv=wv, bv=bv, wo=wo, bo=bo)


def init_params(key, dim_input):
    ks = jax.random.split(key, 7)
    p = {}
    p["ln1_g"] = jnp.ones((dim_input,), jnp.float32)
    p["ln1_b"] = jnp.zeros((dim_input,), jnp.float32)
    p["ln2_g"] = 1.0 + 0.1 * jax.random.normal(ks[0], (dim_input,), jnp.float32)
    p["ln2_b"] = 0.1 * jax.random.normal(ks[1], (dim_input,), jnp.float32)
    p["ln3_g"] = 1.0 + 0.1 * jax.random.normal(ks[2], (dim_input,), jnp.float32)
    p["ln3_b"] = 0.1 * jax.random.normal(ks[3], (dim_input,), jnp.float32)
    p["self_attn"] = _init_mha(ks[4], dim_input)
    p["cross_attn"] = _init_mha(ks[5], dim_input)
    kf1, kf2 = jax.random.split(ks[6])
    p["ffn_w1"], p["ffn_b1"] = _init_linear(kf1, dim_input, 4 * dim_input)
    p["ffn_w2"], p["ffn_b2"] = _init_linear(kf2, 4 * dim_input, dim_input)
    return p


# ---------------------------------------------------------------------------
# Pure-JAX f32 reference (mirrors the PyTorch forward) for verification
# ---------------------------------------------------------------------------

def _ref_ln(x, g, b, eps=1e-5):
    m = jnp.mean(x, -1, keepdims=True)
    v = jnp.mean((x - m) ** 2, -1, keepdims=True)
    return (x - m) / jnp.sqrt(v + eps) * g + b


def _ref_mha(p, Q, K, V, mask, H, Da):
    B, Sq, D = Q.shape
    Sk = K.shape[1]
    q = (Q @ p["wq"] + p["bq"]).reshape(B, Sq, H, Da).transpose(0, 2, 1, 3)
    k = (K @ p["wk"] + p["bk"]).reshape(B, Sk, H, Da).transpose(0, 2, 1, 3)
    v = (V @ p["wv"] + p["bv"]).reshape(B, Sk, H, Da).transpose(0, 2, 1, 3)
    s = q @ k.transpose(0, 1, 3, 2) / math.sqrt(Da)
    if mask is not None:
        s = jnp.where(mask, _NEG_INF, s)
    s = jax.nn.softmax(s, axis=-1)
    a = (s @ v).transpose(0, 2, 1, 3).reshape(B, Sq, D)
    return a @ p["wo"] + p["bo"]


def _ref_decoder(p, X, enc, en_mask, de_mask, H, Da):
    x1 = _ref_ln(X, p["ln1_g"], p["ln1_b"])
    x1 = _ref_mha(p["self_attn"], x1, x1, x1, de_mask, H, Da)
    res = X + x1
    r1 = _ref_ln(res, p["ln2_g"], p["ln2_b"])
    res2 = res + _ref_mha(p["cross_attn"], r1, enc, enc, en_mask, H, Da)
    r3 = _ref_ln(res2, p["ln3_g"], p["ln3_b"])
    h = jnp.maximum(r3 @ p["ffn_w1"] + p["ffn_b1"], 0.0)
    return res2 + (h @ p["ffn_w2"] + p["ffn_b2"])


# ---------------------------------------------------------------------------

if __name__ == "__main__":
    B, S, S_enc = 2, 8, 8
    num_heads, dim_attention = 4, 8
    D = num_heads * dim_attention  # 32

    key = jax.random.PRNGKey(0)
    kx, ke, kp = jax.random.split(key, 3)
    X = jax.random.normal(kx, (B, S, D), jnp.float32)
    enc_outputs = jax.random.normal(ke, (B, S_enc, D), jnp.float32)
    params = init_params(kp, D)
    fused_params = prepare_fused_params(params, dim_attention)   # one-time prep

    fwd = jax.jit(functools.partial(transformer_decoder_cell,
                                    num_heads=num_heads,
                                    dim_attention=dim_attention))
    out = jax.block_until_ready(fwd(fused_params, X, enc_outputs))

    # f32 reference: causal mask for self-attention, no mask for cross-attn
    de_tgt_mask = jnp.triu(jnp.ones((S, S), jnp.bool_), k=1)[None, None]
    ref = _ref_decoder(params, X, enc_outputs, None, de_tgt_mask,
                       num_heads, dim_attention)

    assert out.shape == (B, S, D)
    # tolerance accounts for bf16 MXU inputs (f32 accumulation) + approx recip
    assert jnp.allclose(out, ref, atol=3e-2, rtol=3e-2), "mismatch vs reference"

    print("KERNEL_OK")
</pallas_src>

<mosaic_0001>
module attributes {stable_mosaic.version = 11 : i64} {
  func.func @_decoder_cell_kernel(%arg0: i32, %arg1: memref<1x8x32xf32, #tpu.memory_space<vmem>>, %arg2: memref<1x8x32xf32, #tpu.memory_space<vmem>>, %arg3: memref<1x32xf32, #tpu.memory_space<vmem>>, %arg4: memref<1x32xf32, #tpu.memory_space<vmem>>, %arg5: memref<32x96xbf16, #tpu.memory_space<vmem>>, %arg6: memref<1x96xf32, #tpu.memory_space<vmem>>, %arg7: memref<32x32xbf16, #tpu.memory_space<vmem>>, %arg8: memref<1x32xf32, #tpu.memory_space<vmem>>, %arg9: memref<1x32xf32, #tpu.memory_space<vmem>>, %arg10: memref<1x32xf32, #tpu.memory_space<vmem>>, %arg11: memref<32x32xbf16, #tpu.memory_space<vmem>>, %arg12: memref<1x32xf32, #tpu.memory_space<vmem>>, %arg13: memref<32x64xbf16, #tpu.memory_space<vmem>>, %arg14: memref<1x64xf32, #tpu.memory_space<vmem>>, %arg15: memref<32x32xbf16, #tpu.memory_space<vmem>>, %arg16: memref<1x32xf32, #tpu.memory_space<vmem>>, %arg17: memref<1x32xf32, #tpu.memory_space<vmem>>, %arg18: memref<1x32xf32, #tpu.memory_space<vmem>>, %arg19: memref<32x128xbf16, #tpu.memory_space<vmem>>, %arg20: memref<1x128xf32, #tpu.memory_space<vmem>>, %arg21: memref<128x32xbf16, #tpu.memory_space<vmem>>, %arg22: memref<1x32xf32, #tpu.memory_space<vmem>>, %arg23: memref<1x8x32xf32, #tpu.memory_space<vmem>>, %arg24: memref<8x32xf32, #tpu.memory_space<vmem>>) attributes {dimension_semantics = [#tpu.dimension_semantics<parallel>], iteration_bounds = array<i64: 2>, scalar_prefetch = 0 : i64, scratch_operands = 1 : i64, tpu.core_type = #tpu.core_type<tc>, window_params = [{transform_indices = @transform_0, window_bounds = array<i64: 1, 8, 32>}, {transform_indices = @transform_1, window_bounds = array<i64: 1, 8, 32>}, {pipeline_mode = #tpu.pipeline_mode<synchronous>, transform_indices = @transform_2, window_bounds = array<i64: 1, 32>}, {pipeline_mode = #tpu.pipeline_mode<synchronous>, transform_indices = @transform_3, window_bounds = array<i64: 1, 32>}, {pipeline_mode = #tpu.pipeline_mode<synchronous>, transform_indices = @transform_4, window_bounds = array<i64: 32, 96>}, {pipeline_mode = #tpu.pipeline_mode<synchronous>, transform_indices = @transform_5, window_bounds = array<i64: 1, 96>}, {pipeline_mode = #tpu.pipeline_mode<synchronous>, transform_indices = @transform_6, window_bounds = array<i64: 32, 32>}, {pipeline_mode = #tpu.pipeline_mode<synchronous>, transform_indices = @transform_7, window_bounds = array<i64: 1, 32>}, {pipeline_mode = #tpu.pipeline_mode<synchronous>, transform_indices = @transform_8, window_bounds = array<i64: 1, 32>}, {pipeline_mode = #tpu.pipeline_mode<synchronous>, transform_indices = @transform_9, window_bounds = array<i64: 1, 32>}, {pipeline_mode = #tpu.pipeline_mode<synchronous>, transform_indices = @transform_10, window_bounds = array<i64: 32, 32>}, {pipeline_mode = #tpu.pipeline_mode<synchronous>, transform_indices = @transform_11, window_bounds = array<i64: 1, 32>}, {pipeline_mode = #tpu.pipeline_mode<synchronous>, transform_indices = @transform_12, window_bounds = array<i64: 32, 64>}, {pipeline_mode = #tpu.pipeline_mode<synchronous>, transform_indices = @transform_13, window_bounds = array<i64: 1, 64>}, {pipeline_mode = #tpu.pipeline_mode<synchronous>, transform_indices = @transform_14, window_bounds = array<i64: 32, 32>}, {pipeline_mode = #tpu.pipeline_mode<synchronous>, transform_indices = @transform_15, window_bounds = array<i64: 1, 32>}, {pipeline_mode = #tpu.pipeline_mode<synchronous>, transform_indices = @transform_16, window_bounds = array<i64: 1, 32>}, {pipeline_mode = #tpu.pipeline_mode<synchronous>, transform_indices = @transform_17, window_bounds = array<i64: 1, 32>}, {pipeline_mode = #tpu.pipeline_mode<synchronous>, transform_indices = @transform_18, window_bounds = array<i64: 32, 128>}, {pipeline_mode = #tpu.pipeline_mode<synchronous>, transform_indices = @transform_19, window_bounds = array<i64: 1, 128>}, {pipeline_mode = #tpu.pipeline_mode<synchronous>, transform_indices = @transform_20, window_bounds = array<i64: 128, 32>}, {pipeline_mode = #tpu.pipeline_mode<synchronous>, transform_indices = @transform_21, window_bounds = array<i64: 1, 32>}, {transform_indices = @transform_22, window_bounds = array<i64: 1, 8, 32>}]} {
    %c0 = arith.constant 0 : index
    %c0_0 = arith.constant 0 : index
    %c0_1 = arith.constant 0 : index
    %0 = vector.load %arg1[%c0, %c0_0, %c0_1] : memref<1x8x32xf32, #tpu.memory_space<vmem>>, vector<1x8x32xf32>
    %1 = vector.shape_cast %0 : vector<1x8x32xf32> to vector<8x32xf32>
    %c0_2 = arith.constant 0 : index
    %c0_3 = arith.constant 0 : index
    %2 = vector.load %arg3[%c0_2, %c0_3] : memref<1x32xf32, #tpu.memory_space<vmem>>, vector<1x32xf32>
    %c0_4 = arith.constant 0 : index
    %c0_5 = arith.constant 0 : index
    %3 = vector.load %arg4[%c0_4, %c0_5] : memref<1x32xf32, #tpu.memory_space<vmem>>, vector<1x32xf32>
    %cst = arith.constant dense<0.000000e+00> : vector<8xf32>
    %4 = vector.multi_reduction <add>, %1, %cst [1] : vector<8x32xf32> to vector<8xf32>
    %5 = vector.shape_cast %4 : vector<8xf32> to vector<8x1xf32>
    %cst_6 = arith.constant 3.200000e+01 : f32
    %6 = vector.broadcast %cst_6 : f32 to vector<8x1xf32>
    %7 = arith.divf %5, %6 : vector<8x1xf32>
    %8 = vector.broadcast %7 : vector<8x1xf32> to vector<8x32xf32>
    %9 = arith.subf %1, %8 : vector<8x32xf32>
    %10 = arith.mulf %9, %9 : vector<8x32xf32>
    %cst_7 = arith.constant dense<0.000000e+00> : vector<8xf32>
    %11 = vector.multi_reduction <add>, %10, %cst_7 [1] : vector<8x32xf32> to vector<8xf32>
    %12 = vector.shape_cast %11 : vector<8xf32> to vector<8x1xf32>
    %cst_8 = arith.constant 3.200000e+01 : f32
    %13 = vector.broadcast %cst_8 : f32 to vector<8x1xf32>
    %14 = arith.divf %12, %13 : vector<8x1xf32>
    %cst_9 = arith.constant 9.99999974E-6 : f32
    %15 = vector.broadcast %cst_9 : f32 to vector<8x1xf32>
    %16 = arith.addf %14, %15 : vector<8x1xf32>
    %17 = math.rsqrt %16 : vector<8x1xf32>
    %18 = vector.broadcast %17 : vector<8x1xf32> to vector<8x32xf32>
    %19 = arith.mulf %9, %18 : vector<8x32xf32>
    %20 = vector.broadcast %2 : vector<1x32xf32> to vector<8x32xf32>
    %21 = arith.mulf %19, %20 : vector<8x32xf32>
    %22 = vector.broadcast %3 : vector<1x32xf32> to vector<8x32xf32>
    %23 = arith.addf %21, %22 : vector<8x32xf32>
    %24 = arith.truncf %23 : vector<8x32xf32> to vector<8x32xbf16>
    %c0_10 = arith.constant 0 : index
    %c0_11 = arith.constant 0 : index
    %25 = vector.load %arg5[%c0_10, %c0_11] : memref<32x96xbf16, #tpu.memory_space<vmem>>, vector<32x96xbf16>
    %cst_12 = arith.constant dense<0.000000e+00> : vector<8x96xf32>
    %26 = tpu.matmul %24, %25, %cst_12 {dimension_numbers = #tpu.dot_dimension_numbers<[1], [0], [0], [1], [0, 0, 1, 1], [], []>} : vector<8x32xbf16>, vector<32x96xbf16>, vector<8x96xf32> -> vector<8x96xf32>
    %c0_13 = arith.constant 0 : index
    %c0_14 = arith.constant 0 : index
    %27 = vector.load %arg6[%c0_13, %c0_14] : memref<1x96xf32, #tpu.memory_space<vmem>>, vector<1x96xf32>
    %28 = vector.broadcast %27 : vector<1x96xf32> to vector<8x96xf32>
    %29 = arith.addf %26, %28 : vector<8x96xf32>
    %30 = vector.extract_strided_slice %29 {offsets = [0, 0], sizes = [8, 32], strides = [1, 1]} : vector<8x96xf32> to vector<8x32xf32>
    %31 = vector.extract_strided_slice %29 {offsets = [0, 32], sizes = [8, 32], strides = [1, 1]} : vector<8x96xf32> to vector<8x32xf32>
    %32 = vector.extract_strided_slice %29 {offsets = [0, 64], sizes = [8, 32], strides = [1, 1]} : vector<8x96xf32> to vector<8x32xf32>
    %33 = tpu.iota {dimensions = array<i32: 0>} : vector<8x8xi32>
    %34 = tpu.iota {dimensions = array<i32: 1>} : vector<8x8xi32>
    %35 = arith.cmpi sgt, %34, %33 : vector<8x8xi32>
    %36 = vector.extract_strided_slice %30 {offsets = [0, 0], sizes = [8, 8], strides = [1, 1]} : vector<8x32xf32> to vector<8x8xf32>
    %37 = arith.truncf %36 : vector<8x8xf32> to vector<8x8xbf16>
    %38 = vector.extract_strided_slice %31 {offsets = [0, 0], sizes = [8, 8], strides = [1, 1]} : vector<8x32xf32> to vector<8x8xf32>
    %39 = arith.truncf %38 : vector<8x8xf32> to vector<8x8xbf16>
    %40 = vector.extract_strided_slice %32 {offsets = [0, 0], sizes = [8, 8], strides = [1, 1]} : vector<8x32xf32> to vector<8x8xf32>
    %41 = arith.truncf %40 : vector<8x8xf32> to vector<8x8xbf16>
    %cst_15 = arith.constant dense<0.000000e+00> : vector<8x8xf32>
    %42 = tpu.matmul %37, %39, %cst_15 {dimension_numbers = #tpu.dot_dimension_numbers<[1], [1], [0], [0], [0, 0, 1, 0], [], []>} : vector<8x8xbf16>, vector<8x8xbf16>, vector<8x8xf32> -> vector<8x8xf32>
    %cst_16 = arith.constant -1.000000e+06 : f32
    %43 = vector.broadcast %cst_16 : f32 to vector<8x8xf32>
    %44 = arith.select %35, %43, %42 : vector<8x8xi1>, vector<8x8xf32>
    %cst_17 = arith.constant dense<0xFF800000> : vector<8xf32>
    %45 = vector.multi_reduction <maximumf>, %44, %cst_17 [1] : vector<8x8xf32> to vector<8xf32>
    %46 = vector.shape_cast %45 : vector<8xf32> to vector<8x1xf32>
    %47 = vector.broadcast %46 : vector<8x1xf32> to vector<8x8xf32>
    %48 = arith.subf %44, %47 : vector<8x8xf32>
    %49 = math.exp %48 : vector<8x8xf32>
    %cst_18 = arith.constant dense<0.000000e+00> : vector<8xf32>
    %50 = vector.multi_reduction <add>, %49, %cst_18 [1] : vector<8x8xf32> to vector<8xf32>
    %51 = vector.shape_cast %50 : vector<8xf32> to vector<8x1xf32>
    %52 = tpu.reciprocal %51 {approx = true} : vector<8x1xf32> -> vector<8x1xf32>
    %53 = vector.broadcast %52 : vector<8x1xf32> to vector<8x8xf32>
    %54 = arith.mulf %49, %53 : vector<8x8xf32>
    %55 = arith.truncf %54 : vector<8x8xf32> to vector<8x8xbf16>
    %cst_19 = arith.constant dense<0.000000e+00> : vector<8x8xf32>
    %56 = tpu.matmul %55, %41, %cst_19 {dimension_numbers = #tpu.dot_dimension_numbers<[1], [0], [0], [1], [0, 0, 1, 1], [], []>} : vector<8x8xbf16>, vector<8x8xbf16>, vector<8x8xf32> -> vector<8x8xf32>
    %c0_20 = arith.constant 0 : index
    %c0_21 = arith.constant 0 : index
    %57 = vector.load %arg24[%c0_20, %c0_21] : memref<8x32xf32, #tpu.memory_space<vmem>>, vector<8x8xf32>
    tpu.vector_store %arg24[%c0_20, %c0_21], %56 {strides = array<i32>} : memref<8x32xf32, #tpu.memory_space<vmem>>, vector<8x8xf32>,
    %58 = vector.extract_strided_slice %30 {offsets = [0, 8], sizes = [8, 8], strides = [1, 1]} : vector<8x32xf32> to vector<8x8xf32>
    %59 = arith.truncf %58 : vector<8x8xf32> to vector<8x8xbf16>
    %60 = vector.extract_strided_slice %31 {offsets = [0, 8], sizes = [8, 8], strides = [1, 1]} : vector<8x32xf32> to vector<8x8xf32>
    %61 = arith.truncf %60 : vector<8x8xf32> to vector<8x8xbf16>
    %62 = vector.extract_strided_slice %32 {offsets = [0, 8], sizes = [8, 8], strides = [1, 1]} : vector<8x32xf32> to vector<8x8xf32>
    %63 = arith.truncf %62 : vector<8x8xf32> to vector<8x8xbf16>
    %cst_22 = arith.constant dense<0.000000e+00> : vector<8x8xf32>
    %64 = tpu.matmul %59, %61, %cst_22 {dimension_numbers = #tpu.dot_dimension_numbers<[1], [1], [0], [0], [0, 0, 1, 0], [], []>} : vector<8x8xbf16>, vector<8x8xbf16>, vector<8x8xf32> -> vector<8x8xf32>
    %cst_23 = arith.constant -1.000000e+06 : f32
    %65 = vector.broadcast %cst_23 : f32 to vector<8x8xf32>
    %66 = arith.select %35, %65, %64 : vector<8x8xi1>, vector<8x8xf32>
    %cst_24 = arith.constant dense<0xFF800000> : vector<8xf32>
    %67 = vector.multi_reduction <maximumf>, %66, %cst_24 [1] : vector<8x8xf32> to vector<8xf32>
    %68 = vector.shape_cast %67 : vector<8xf32> to vector<8x1xf32>
    %69 = vector.broadcast %68 : vector<8x1xf32> to vector<8x8xf32>
    %70 = arith.subf %66, %69 : vector<8x8xf32>
    %71 = math.exp %70 : vector<8x8xf32>
    %cst_25 = arith.constant dense<0.000000e+00> : vector<8xf32>
    %72 = vector.multi_reduction <add>, %71, %cst_25 [1] : vector<8x8xf32> to vector<8xf32>
    %73 = vector.shape_cast %72 : vector<8xf32> to vector<8x1xf32>
    %74 = tpu.reciprocal %73 {approx = true} : vector<8x1xf32> -> vector<8x1xf32>
    %75 = vector.broadcast %74 : vector<8x1xf32> to vector<8x8xf32>
    %76 = arith.mulf %71, %75 : vector<8x8xf32>
    %77 = arith.truncf %76 : vector<8x8xf32> to vector<8x8xbf16>
    %cst_26 = arith.constant dense<0.000000e+00> : vector<8x8xf32>
    %78 = tpu.matmul %77, %63, %cst_26 {dimension_numbers = #tpu.dot_dimension_numbers<[1], [0], [0], [1], [0, 0, 1, 1], [], []>} : vector<8x8xbf16>, vector<8x8xbf16>, vector<8x8xf32> -> vector<8x8xf32>
    %c0_27 = arith.constant 0 : index
    %c8 = arith.constant 8 : index
    %79 = vector.load %arg24[%c0_27, %c8] : memref<8x32xf32, #tpu.memory_space<vmem>>, vector<8x8xf32>
    tpu.vector_store %arg24[%c0_27, %c8], %78 {strides = array<i32>} : memref<8x32xf32, #tpu.memory_space<vmem>>, vector<8x8xf32>,
    %80 = vector.extract_strided_slice %30 {offsets = [0, 16], sizes = [8, 8], strides = [1, 1]} : vector<8x32xf32> to vector<8x8xf32>
    %81 = arith.truncf %80 : vector<8x8xf32> to vector<8x8xbf16>
    %82 = vector.extract_strided_slice %31 {offsets = [0, 16], sizes = [8, 8], strides = [1, 1]} : vector<8x32xf32> to vector<8x8xf32>
    %83 = arith.truncf %82 : vector<8x8xf32> to vector<8x8xbf16>
    %84 = vector.extract_strided_slice %32 {offsets = [0, 16], sizes = [8, 8], strides = [1, 1]} : vector<8x32xf32> to vector<8x8xf32>
    %85 = arith.truncf %84 : vector<8x8xf32> to vector<8x8xbf16>
    %cst_28 = arith.constant dense<0.000000e+00> : vector<8x8xf32>
    %86 = tpu.matmul %81, %83, %cst_28 {dimension_numbers = #tpu.dot_dimension_numbers<[1], [1], [0], [0], [0, 0, 1, 0], [], []>} : vector<8x8xbf16>, vector<8x8xbf16>, vector<8x8xf32> -> vector<8x8xf32>
    %cst_29 = arith.constant -1.000000e+06 : f32
    %87 = vector.broadcast %cst_29 : f32 to vector<8x8xf32>
    %88 = arith.select %35, %87, %86 : vector<8x8xi1>, vector<8x8xf32>
    %cst_30 = arith.constant dense<0xFF800000> : vector<8xf32>
    %89 = vector.multi_reduction <maximumf>, %88, %cst_30 [1] : vector<8x8xf32> to vector<8xf32>
    %90 = vector.shape_cast %89 : vector<8xf32> to vector<8x1xf32>
    %91 = vector.broadcast %90 : vector<8x1xf32> to vector<8x8xf32>
    %92 = arith.subf %88, %91 : vector<8x8xf32>
    %93 = math.exp %92 : vector<8x8xf32>
    %cst_31 = arith.constant dense<0.000000e+00> : vector<8xf32>
    %94 = vector.multi_reduction <add>, %93, %cst_31 [1] : vector<8x8xf32> to vector<8xf32>
    %95 = vector.shape_cast %94 : vector<8xf32> to vector<8x1xf32>
    %96 = tpu.reciprocal %95 {approx = true} : vector<8x1xf32> -> vector<8x1xf32>
    %97 = vector.broadcast %96 : vector<8x1xf32> to vector<8x8xf32>
    %98 = arith.mulf %93, %97 : vector<8x8xf32>
    %99 = arith.truncf %98 : vector<8x8xf32> to vector<8x8xbf16>
    %cst_32 = arith.constant dense<0.000000e+00> : vector<8x8xf32>
    %100 = tpu.matmul %99, %85, %cst_32 {dimension_numbers = #tpu.dot_dimension_numbers<[1], [0], [0], [1], [0, 0, 1, 1], [], []>} : vector<8x8xbf16>, vector<8x8xbf16>, vector<8x8xf32> -> vector<8x8xf32>
    %c0_33 = arith.constant 0 : index
    %c16 = arith.constant 16 : index
    %101 = vector.load %arg24[%c0_33, %c16] : memref<8x32xf32, #tpu.memory_space<vmem>>, vector<8x8xf32>
    tpu.vector_store %arg24[%c0_33, %c16], %100 {strides = array<i32>} : memref<8x32xf32, #tpu.memory_space<vmem>>, vector<8x8xf32>,
    %102 = vector.extract_strided_slice %30 {offsets = [0, 24], sizes = [8, 8], strides = [1, 1]} : vector<8x32xf32> to vector<8x8xf32>
    %103 = arith.truncf %102 : vector<8x8xf32> to vector<8x8xbf16>
    %104 = vector.extract_strided_slice %31 {offsets = [0, 24], sizes = [8, 8], strides = [1, 1]} : vector<8x32xf32> to vector<8x8xf32>
    %105 = arith.truncf %104 : vector<8x8xf32> to vector<8x8xbf16>
    %106 = vector.extract_strided_slice %32 {offsets = [0, 24], sizes = [8, 8], strides = [1, 1]} : vector<8x32xf32> to vector<8x8xf32>
    %107 = arith.truncf %106 : vector<8x8xf32> to vector<8x8xbf16>
    %cst_34 = arith.constant dense<0.000000e+00> : vector<8x8xf32>
    %108 = tpu.matmul %103, %105, %cst_34 {dimension_numbers = #tpu.dot_dimension_numbers<[1], [1], [0], [0], [0, 0, 1, 0], [], []>} : vector<8x8xbf16>, vector<8x8xbf16>, vector<8x8xf32> -> vector<8x8xf32>
    %cst_35 = arith.constant -1.000000e+06 : f32
    %109 = vector.broadcast %cst_35 : f32 to vector<8x8xf32>
    %110 = arith.select %35, %109, %108 : vector<8x8xi1>, vector<8x8xf32>
    %cst_36 = arith.constant dense<0xFF800000> : vector<8xf32>
    %111 = vector.multi_reduction <maximumf>, %110, %cst_36 [1] : vector<8x8xf32> to vector<8xf32>
    %112 = vector.shape_cast %111 : vector<8xf32> to vector<8x1xf32>
    %113 = vector.broadcast %112 : vector<8x1xf32> to vector<8x8xf32>
    %114 = arith.subf %110, %113 : vector<8x8xf32>
    %115 = math.exp %114 : vector<8x8xf32>
    %cst_37 = arith.constant dense<0.000000e+00> : vector<8xf32>
    %116 = vector.multi_reduction <add>, %115, %cst_37 [1] : vector<8x8xf32> to vector<8xf32>
    %117 = vector.shape_cast %116 : vector<8xf32> to vector<8x1xf32>
    %118 = tpu.reciprocal %117 {approx = true} : vector<8x1xf32> -> vector<8x1xf32>
    %119 = vector.broadcast %118 : vector<8x1xf32> to vector<8x8xf32>
    %120 = arith.mulf %115, %119 : vector<8x8xf32>
    %121 = arith.truncf %120 : vector<8x8xf32> to vector<8x8xbf16>
    %cst_38 = arith.constant dense<0.000000e+00> : vector<8x8xf32>
    %122 = tpu.matmul %121, %107, %cst_38 {dimension_numbers = #tpu.dot_dimension_numbers<[1], [0], [0], [1], [0, 0, 1, 1], [], []>} : vector<8x8xbf16>, vector<8x8xbf16>, vector<8x8xf32> -> vector<8x8xf32>
    %c0_39 = arith.constant 0 : index
    %c24 = arith.constant 24 : index
    %123 = vector.load %arg24[%c0_39, %c24] : memref<8x32xf32, #tpu.memory_space<vmem>>, vector<8x8xf32>
    tpu.vector_store %arg24[%c0_39, %c24], %122 {strides = array<i32>} : memref<8x32xf32, #tpu.memory_space<vmem>>, vector<8x8xf32>,
    %c0_40 = arith.constant 0 : index
    %c0_41 = arith.constant 0 : index
    %124 = vector.load %arg24[%c0_40, %c0_41] : memref<8x32xf32, #tpu.memory_space<vmem>>, vector<8x32xf32>
    %125 = arith.truncf %124 : vector<8x32xf32> to vector<8x32xbf16>
    %c0_42 = arith.constant 0 : index
    %c0_43 = arith.constant 0 : index
    %126 = vector.load %arg7[%c0_42, %c0_43] : memref<32x32xbf16, #tpu.memory_space<vmem>>, vector<32x32xbf16>
    %cst_44 = arith.constant dense<0.000000e+00> : vector<8x32xf32>
    %127 = tpu.matmul %125, %126, %cst_44 {dimension_numbers = #tpu.dot_dimension_numbers<[1], [0], [0], [1], [0, 0, 1, 1], [], []>} : vector<8x32xbf16>, vector<32x32xbf16>, vector<8x32xf32> -> vector<8x32xf32>
    %128 = arith.addf %1, %127 : vector<8x32xf32>
    %c0_45 = arith.constant 0 : index
    %c0_46 = arith.constant 0 : index
    %129 = vector.load %arg8[%c0_45, %c0_46] : memref<1x32xf32, #tpu.memory_space<vmem>>, vector<1x32xf32>
    %130 = vector.broadcast %129 : vector<1x32xf32> to vector<8x32xf32>
    %131 = arith.addf %128, %130 : vector<8x32xf32>
    %c0_47 = arith.constant 0 : index
    %c0_48 = arith.constant 0 : index
    %132 = vector.load %arg9[%c0_47, %c0_48] : memref<1x32xf32, #tpu.memory_space<vmem>>, vector<1x32xf32>
    %c0_49 = arith.constant 0 : index
    %c0_50 = arith.constant 0 : index
    %133 = vector.load %arg10[%c0_49, %c0_50] : memref<1x32xf32, #tpu.memory_space<vmem>>, vector<1x32xf32>
    %cst_51 = arith.constant dense<0.000000e+00> : vector<8xf32>
    %134 = vector.multi_reduction <add>, %131, %cst_51 [1] : vector<8x32xf32> to vector<8xf32>
    %135 = vector.shape_cast %134 : vector<8xf32> to vector<8x1xf32>
    %cst_52 = arith.constant 3.200000e+01 : f32
    %136 = vector.broadcast %cst_52 : f32 to vector<8x1xf32>
    %137 = arith.divf %135, %136 : vector<8x1xf32>
    %138 = vector.broadcast %137 : vector<8x1xf32> to vector<8x32xf32>
    %139 = arith.subf %131, %138 : vector<8x32xf32>
    %140 = arith.mulf %139, %139 : vector<8x32xf32>
    %cst_53 = arith.constant dense<0.000000e+00> : vector<8xf32>
    %141 = vector.multi_reduction <add>, %140, %cst_53 [1] : vector<8x32xf32> to vector<8xf32>
    %142 = vector.shape_cast %141 : vector<8xf32> to vector<8x1xf32>
    %cst_54 = arith.constant 3.200000e+01 : f32
    %143 = vector.broadcast %cst_54 : f32 to vector<8x1xf32>
    %144 = arith.divf %142, %143 : vector<8x1xf32>
    %cst_55 = arith.constant 9.99999974E-6 : f32
    %145 = vector.broadcast %cst_55 : f32 to vector<8x1xf32>
    %146 = arith.addf %144, %145 : vector<8x1xf32>
    %147 = math.rsqrt %146 : vector<8x1xf32>
    %148 = vector.broadcast %147 : vector<8x1xf32> to vector<8x32xf32>
    %149 = arith.mulf %139, %148 : vector<8x32xf32>
    %150 = vector.broadcast %132 : vector<1x32xf32> to vector<8x32xf32>
    %151 = arith.mulf %149, %150 : vector<8x32xf32>
    %152 = vector.broadcast %133 : vector<1x32xf32> to vector<8x32xf32>
    %153 = arith.addf %151, %152 : vector<8x32xf32>
    %154 = arith.truncf %153 : vector<8x32xf32> to vector<8x32xbf16>
    %c0_56 = arith.constant 0 : index
    %c0_57 = arith.constant 0 : index
    %155 = vector.load %arg11[%c0_56, %c0_57] : memref<32x32xbf16, #tpu.memory_space<vmem>>, vector<32x32xbf16>
    %cst_58 = arith.constant dense<0.000000e+00> : vector<8x32xf32>
    %156 = tpu.matmul %154, %155, %cst_58 {dimension_numbers = #tpu.dot_dimension_numbers<[1], [0], [0], [1], [0, 0, 1, 1], [], []>} : vector<8x32xbf16>, vector<32x32xbf16>, vector<8x32xf32> -> vector<8x32xf32>
    %c0_59 = arith.constant 0 : index
    %c0_60 = arith.constant 0 : index
    %157 = vector.load %arg12[%c0_59, %c0_60] : memref<1x32xf32, #tpu.memory_space<vmem>>, vector<1x32xf32>
    %158 = vector.broadcast %157 : vector<1x32xf32> to vector<8x32xf32>
    %159 = arith.addf %156, %158 : vector<8x32xf32>
    %c0_61 = arith.constant 0 : index
    %c0_62 = arith.constant 0 : index
    %c0_63 = arith.constant 0 : index
    %160 = vector.load %arg2[%c0_61, %c0_62, %c0_63] : memref<1x8x32xf32, #tpu.memory_space<vmem>>, vector<1x8x32xf32>
    %161 = vector.shape_cast %160 : vector<1x8x32xf32> to vector<8x32xf32>
    %162 = arith.truncf %161 : vector<8x32xf32> to vector<8x32xbf16>
    %c0_64 = arith.constant 0 : index
    %c0_65 = arith.constant 0 : index
    %163 = vector.load %arg13[%c0_64, %c0_65] : memref<32x64xbf16, #tpu.memory_space<vmem>>, vector<32x64xbf16>
    %cst_66 = arith.constant dense<0.000000e+00> : vector<8x64xf32>
    %164 = tpu.matmul %162, %163, %cst_66 {dimension_numbers = #tpu.dot_dimension_numbers<[1], [0], [0], [1], [0, 0, 1, 1], [], []>} : vector<8x32xbf16>, vector<32x64xbf16>, vector<8x64xf32> -> vector<8x64xf32>
    %c0_67 = arith.constant 0 : index
    %c0_68 = arith.constant 0 : index
    %165 = vector.load %arg14[%c0_67, %c0_68] : memref<1x64xf32, #tpu.memory_space<vmem>>, vector<1x64xf32>
    %166 = vector.broadcast %165 : vector<1x64xf32> to vector<8x64xf32>
    %167 = arith.addf %164, %166 : vector<8x64xf32>
    %168 = vector.extract_strided_slice %167 {offsets = [0, 0], sizes = [8, 32], strides = [1, 1]} : vector<8x64xf32> to vector<8x32xf32>
    %169 = vector.extract_strided_slice %167 {offsets = [0, 32], sizes = [8, 32], strides = [1, 1]} : vector<8x64xf32> to vector<8x32xf32>
    %170 = vector.extract_strided_slice %159 {offsets = [0, 0], sizes = [8, 8], strides = [1, 1]} : vector<8x32xf32> to vector<8x8xf32>
    %171 = arith.truncf %170 : vector<8x8xf32> to vector<8x8xbf16>
    %172 = vector.extract_strided_slice %168 {offsets = [0, 0], sizes = [8, 8], strides = [1, 1]} : vector<8x32xf32> to vector<8x8xf32>
    %173 = arith.truncf %172 : vector<8x8xf32> to vector<8x8xbf16>
    %174 = vector.extract_strided_slice %169 {offsets = [0, 0], sizes = [8, 8], strides = [1, 1]} : vector<8x32xf32> to vector<8x8xf32>
    %175 = arith.truncf %174 : vector<8x8xf32> to vector<8x8xbf16>
    %cst_69 = arith.constant dense<0.000000e+00> : vector<8x8xf32>
    %176 = tpu.matmul %171, %173, %cst_69 {dimension_numbers = #tpu.dot_dimension_numbers<[1], [1], [0], [0], [0, 0, 1, 0], [], []>} : vector<8x8xbf16>, vector<8x8xbf16>, vector<8x8xf32> -> vector<8x8xf32>
    %cst_70 = arith.constant dense<0xFF800000> : vector<8xf32>
    %177 = vector.multi_reduction <maximumf>, %176, %cst_70 [1] : vector<8x8xf32> to vector<8xf32>
    %178 = vector.shape_cast %177 : vector<8xf32> to vector<8x1xf32>
    %179 = vector.broadcast %178 : vector<8x1xf32> to vector<8x8xf32>
    %180 = arith.subf %176, %179 : vector<8x8xf32>
    %181 = math.exp %180 : vector<8x8xf32>
    %cst_71 = arith.constant dense<0.000000e+00> : vector<8xf32>
    %182 = vector.multi_reduction <add>, %181, %cst_71 [1] : vector<8x8xf32> to vector<8xf32>
    %183 = vector.shape_cast %182 : vector<8xf32> to vector<8x1xf32>
    %184 = tpu.reciprocal %183 {approx = true} : vector<8x1xf32> -> vector<8x1xf32>
    %185 = vector.broadcast %184 : vector<8x1xf32> to vector<8x8xf32>
    %186 = arith.mulf %181, %185 : vector<8x8xf32>
    %187 = arith.truncf %186 : vector<8x8xf32> to vector<8x8xbf16>
    %cst_72 = arith.constant dense<0.000000e+00> : vector<8x8xf32>
    %188 = tpu.matmul %187, %175, %cst_72 {dimension_numbers = #tpu.dot_dimension_numbers<[1], [0], [0], [1], [0, 0, 1, 1], [], []>} : vector<8x8xbf16>, vector<8x8xbf16>, vector<8x8xf32> -> vector<8x8xf32>
    %c0_73 = arith.constant 0 : index
    %c0_74 = arith.constant 0 : index
    %189 = vector.load %arg24[%c0_73, %c0_74] : memref<8x32xf32, #tpu.memory_space<vmem>>, vector<8x8xf32>
    tpu.vector_store %arg24[%c0_73, %c0_74], %188 {strides = array<i32>} : memref<8x32xf32, #tpu.memory_space<vmem>>, vector<8x8xf32>,
    %190 = vector.extract_strided_slice %159 {offsets = [0, 8], sizes = [8, 8], strides = [1, 1]} : vector<8x32xf32> to vector<8x8xf32>
    %191 = arith.truncf %190 : vector<8x8xf32> to vector<8x8xbf16>
    %192 = vector.extract_strided_slice %168 {offsets = [0, 8], sizes = [8, 8], strides = [1, 1]} : vector<8x32xf32> to vector<8x8xf32>
    %193 = arith.truncf %192 : vector<8x8xf32> to vector<8x8xbf16>
    %194 = vector.extract_strided_slice %169 {offsets = [0, 8], sizes = [8, 8], strides = [1, 1]} : vector<8x32xf32> to vector<8x8xf32>
    %195 = arith.truncf %194 : vector<8x8xf32> to vector<8x8xbf16>
    %cst_75 = arith.constant dense<0.000000e+00> : vector<8x8xf32>
    %196 = tpu.matmul %191, %193, %cst_75 {dimension_numbers = #tpu.dot_dimension_numbers<[1], [1], [0], [0], [0, 0, 1, 0], [], []>} : vector<8x8xbf16>, vector<8x8xbf16>, vector<8x8xf32> -> vector<8x8xf32>
    %cst_76 = arith.constant dense<0xFF800000> : vector<8xf32>
    %197 = vector.multi_reduction <maximumf>, %196, %cst_76 [1] : vector<8x8xf32> to vector<8xf32>
    %198 = vector.shape_cast %197 : vector<8xf32> to vector<8x1xf32>
    %199 = vector.broadcast %198 : vector<8x1xf32> to vector<8x8xf32>
    %200 = arith.subf %196, %199 : vector<8x8xf32>
    %201 = math.exp %200 : vector<8x8xf32>
    %cst_77 = arith.constant dense<0.000000e+00> : vector<8xf32>
    %202 = vector.multi_reduction <add>, %201, %cst_77 [1] : vector<8x8xf32> to vector<8xf32>
    %203 = vector.shape_cast %202 : vector<8xf32> to vector<8x1xf32>
    %204 = tpu.reciprocal %203 {approx = true} : vector<8x1xf32> -> vector<8x1xf32>
    %205 = vector.broadcast %204 : vector<8x1xf32> to vector<8x8xf32>
    %206 = arith.mulf %201, %205 : vector<8x8xf32>
    %207 = arith.truncf %206 : vector<8x8xf32> to vector<8x8xbf16>
    %cst_78 = arith.constant dense<0.000000e+00> : vector<8x8xf32>
    %208 = tpu.matmul %207, %195, %cst_78 {dimension_numbers = #tpu.dot_dimension_numbers<[1], [0], [0], [1], [0, 0, 1, 1], [], []>} : vector<8x8xbf16>, vector<8x8xbf16>, vector<8x8xf32> -> vector<8x8xf32>
    %c0_79 = arith.constant 0 : index
    %c8_80 = arith.constant 8 : index
    %209 = vector.load %arg24[%c0_79, %c8_80] : memref<8x32xf32, #tpu.memory_space<vmem>>, vector<8x8xf32>
    tpu.vector_store %arg24[%c0_79, %c8_80], %208 {strides = array<i32>} : memref<8x32xf32, #tpu.memory_space<vmem>>, vector<8x8xf32>,
    %210 = vector.extract_strided_slice %159 {offsets = [0, 16], sizes = [8, 8], strides = [1, 1]} : vector<8x32xf32> to vector<8x8xf32>
    %211 = arith.truncf %210 : vector<8x8xf32> to vector<8x8xbf16>
    %212 = vector.extract_strided_slice %168 {offsets = [0, 16], sizes = [8, 8], strides = [1, 1]} : vector<8x32xf32> to vector<8x8xf32>
    %213 = arith.truncf %212 : vector<8x8xf32> to vector<8x8xbf16>
    %214 = vector.extract_strided_slice %169 {offsets = [0, 16], sizes = [8, 8], strides = [1, 1]} : vector<8x32xf32> to vector<8x8xf32>
    %215 = arith.truncf %214 : vector<8x8xf32> to vector<8x8xbf16>
    %cst_81 = arith.constant dense<0.000000e+00> : vector<8x8xf32>
    %216 = tpu.matmul %211, %213, %cst_81 {dimension_numbers = #tpu.dot_dimension_numbers<[1], [1], [0], [0], [0, 0, 1, 0], [], []>} : vector<8x8xbf16>, vector<8x8xbf16>, vector<8x8xf32> -> vector<8x8xf32>
    %cst_82 = arith.constant dense<0xFF800000> : vector<8xf32>
    %217 = vector.multi_reduction <maximumf>, %216, %cst_82 [1] : vector<8x8xf32> to vector<8xf32>
    %218 = vector.shape_cast %217 : vector<8xf32> to vector<8x1xf32>
    %219 = vector.broadcast %218 : vector<8x1xf32> to vector<8x8xf32>
    %220 = arith.subf %216, %219 : vector<8x8xf32>
    %221 = math.exp %220 : vector<8x8xf32>
    %cst_83 = arith.constant dense<0.000000e+00> : vector<8xf32>
    %222 = vector.multi_reduction <add>, %221, %cst_83 [1] : vector<8x8xf32> to vector<8xf32>
    %223 = vector.shape_cast %222 : vector<8xf32> to vector<8x1xf32>
    %224 = tpu.reciprocal %223 {approx = true} : vector<8x1xf32> -> vector<8x1xf32>
    %225 = vector.broadcast %224 : vector<8x1xf32> to vector<8x8xf32>
    %226 = arith.mulf %221, %225 : vector<8x8xf32>
    %227 = arith.truncf %226 : vector<8x8xf32> to vector<8x8xbf16>
    %cst_84 = arith.constant dense<0.000000e+00> : vector<8x8xf32>
    %228 = tpu.matmul %227, %215, %cst_84 {dimension_numbers = #tpu.dot_dimension_numbers<[1], [0], [0], [1], [0, 0, 1, 1], [], []>} : vector<8x8xbf16>, vector<8x8xbf16>, vector<8x8xf32> -> vector<8x8xf32>
    %c0_85 = arith.constant 0 : index
    %c16_86 = arith.constant 16 : index
    %229 = vector.load %arg24[%c0_85, %c16_86] : memref<8x32xf32, #tpu.memory_space<vmem>>, vector<8x8xf32>
    tpu.vector_store %arg24[%c0_85, %c16_86], %228 {strides = array<i32>} : memref<8x32xf32, #tpu.memory_space<vmem>>, vector<8x8xf32>,
    %230 = vector.extract_strided_slice %159 {offsets = [0, 24], sizes = [8, 8], strides = [1, 1]} : vector<8x32xf32> to vector<8x8xf32>
    %231 = arith.truncf %230 : vector<8x8xf32> to vector<8x8xbf16>
    %232 = vector.extract_strided_slice %168 {offsets = [0, 24], sizes = [8, 8], strides = [1, 1]} : vector<8x32xf32> to vector<8x8xf32>
    %233 = arith.truncf %232 : vector<8x8xf32> to vector<8x8xbf16>
    %234 = vector.extract_strided_slice %169 {offsets = [0, 24], sizes = [8, 8], strides = [1, 1]} : vector<8x32xf32> to vector<8x8xf32>
    %235 = arith.truncf %234 : vector<8x8xf32> to vector<8x8xbf16>
    %cst_87 = arith.constant dense<0.000000e+00> : vector<8x8xf32>
    %236 = tpu.matmul %231, %233, %cst_87 {dimension_numbers = #tpu.dot_dimension_numbers<[1], [1], [0], [0], [0, 0, 1, 0], [], []>} : vector<8x8xbf16>, vector<8x8xbf16>, vector<8x8xf32> -> vector<8x8xf32>
    %cst_88 = arith.constant dense<0xFF800000> : vector<8xf32>
    %237 = vector.multi_reduction <maximumf>, %236, %cst_88 [1] : vector<8x8xf32> to vector<8xf32>
    %238 = vector.shape_cast %237 : vector<8xf32> to vector<8x1xf32>
    %239 = vector.broadcast %238 : vector<8x1xf32> to vector<8x8xf32>
    %240 = arith.subf %236, %239 : vector<8x8xf32>
    %241 = math.exp %240 : vector<8x8xf32>
    %cst_89 = arith.constant dense<0.000000e+00> : vector<8xf32>
    %242 = vector.multi_reduction <add>, %241, %cst_89 [1] : vector<8x8xf32> to vector<8xf32>
    %243 = vector.shape_cast %242 : vector<8xf32> to vector<8x1xf32>
    %244 = tpu.reciprocal %243 {approx = true} : vector<8x1xf32> -> vector<8x1xf32>
    %245 = vector.broadcast %244 : vector<8x1xf32> to vector<8x8xf32>
    %246 = arith.mulf %241, %245 : vector<8x8xf32>
    %247 = arith.truncf %246 : vector<8x8xf32> to vector<8x8xbf16>
    %cst_90 = arith.constant dense<0.000000e+00> : vector<8x8xf32>
    %248 = tpu.matmul %247, %235, %cst_90 {dimension_numbers = #tpu.dot_dimension_numbers<[1], [0], [0], [1], [0, 0, 1, 1], [], []>} : vector<8x8xbf16>, vector<8x8xbf16>, vector<8x8xf32> -> vector<8x8xf32>
    %c0_91 = arith.constant 0 : index
    %c24_92 = arith.constant 24 : index
    %249 = vector.load %arg24[%c0_91, %c24_92] : memref<8x32xf32, #tpu.memory_space<vmem>>, vector<8x8xf32>
    tpu.vector_store %arg24[%c0_91, %c24_92], %248 {strides = array<i32>} : memref<8x32xf32, #tpu.memory_space<vmem>>, vector<8x8xf32>,
    %c0_93 = arith.constant 0 : index
    %c0_94 = arith.constant 0 : index
    %250 = vector.load %arg24[%c0_93, %c0_94] : memref<8x32xf32, #tpu.memory_space<vmem>>, vector<8x32xf32>
    %251 = arith.truncf %250 : vector<8x32xf32> to vector<8x32xbf16>
    %c0_95 = arith.constant 0 : index
    %c0_96 = arith.constant 0 : index
    %252 = vector.load %arg15[%c0_95, %c0_96] : memref<32x32xbf16, #tpu.memory_space<vmem>>, vector<32x32xbf16>
    %cst_97 = arith.constant dense<0.000000e+00> : vector<8x32xf32>
    %253 = tpu.matmul %251, %252, %cst_97 {dimension_numbers = #tpu.dot_dimension_numbers<[1], [0], [0], [1], [0, 0, 1, 1], [], []>} : vector<8x32xbf16>, vector<32x32xbf16>, vector<8x32xf32> -> vector<8x32xf32>
    %254 = arith.addf %131, %253 : vector<8x32xf32>
    %c0_98 = arith.constant 0 : index
    %c0_99 = arith.constant 0 : index
    %255 = vector.load %arg16[%c0_98, %c0_99] : memref<1x32xf32, #tpu.memory_space<vmem>>, vector<1x32xf32>
    %256 = vector.broadcast %255 : vector<1x32xf32> to vector<8x32xf32>
    %257 = arith.addf %254, %256 : vector<8x32xf32>
    %c0_100 = arith.constant 0 : index
    %c0_101 = arith.constant 0 : index
    %258 = vector.load %arg17[%c0_100, %c0_101] : memref<1x32xf32, #tpu.memory_space<vmem>>, vector<1x32xf32>
    %c0_102 = arith.constant 0 : index
    %c0_103 = arith.constant 0 : index
    %259 = vector.load %arg18[%c0_102, %c0_103] : memref<1x32xf32, #tpu.memory_space<vmem>>, vector<1x32xf32>
    %cst_104 = arith.constant dense<0.000000e+00> : vector<8xf32>
    %260 = vector.multi_reduction <add>, %257, %cst_104 [1] : vector<8x32xf32> to vector<8xf32>
    %261 = vector.shape_cast %260 : vector<8xf32> to vector<8x1xf32>
    %cst_105 = arith.constant 3.200000e+01 : f32
    %262 = vector.broadcast %cst_105 : f32 to vector<8x1xf32>
    %263 = arith.divf %261, %262 : vector<8x1xf32>
    %264 = vector.broadcast %263 : vector<8x1xf32> to vector<8x32xf32>
    %265 = arith.subf %257, %264 : vector<8x32xf32>
    %266 = arith.mulf %265, %265 : vector<8x32xf32>
    %cst_106 = arith.constant dense<0.000000e+00> : vector<8xf32>
    %267 = vector.multi_reduction <add>, %266, %cst_106 [1] : vector<8x32xf32> to vector<8xf32>
    %268 = vector.shape_cast %267 : vector<8xf32> to vector<8x1xf32>
    %cst_107 = arith.constant 3.200000e+01 : f32
    %269 = vector.broadcast %cst_107 : f32 to vector<8x1xf32>
    %270 = arith.divf %268, %269 : vector<8x1xf32>
    %cst_108 = arith.constant 9.99999974E-6 : f32
    %271 = vector.broadcast %cst_108 : f32 to vector<8x1xf32>
    %272 = arith.addf %270, %271 : vector<8x1xf32>
    %273 = math.rsqrt %272 : vector<8x1xf32>
    %274 = vector.broadcast %273 : vector<8x1xf32> to vector<8x32xf32>
    %275 = arith.mulf %265, %274 : vector<8x32xf32>
    %276 = vector.broadcast %258 : vector<1x32xf32> to vector<8x32xf32>
    %277 = arith.mulf %275, %276 : vector<8x32xf32>
    %278 = vector.broadcast %259 : vector<1x32xf32> to vector<8x32xf32>
    %279 = arith.addf %277, %278 : vector<8x32xf32>
    %280 = arith.truncf %279 : vector<8x32xf32> to vector<8x32xbf16>
    %c0_109 = arith.constant 0 : index
    %c0_110 = arith.constant 0 : index
    %281 = vector.load %arg19[%c0_109, %c0_110] : memref<32x128xbf16, #tpu.memory_space<vmem>>, vector<32x128xbf16>
    %cst_111 = arith.constant dense<0.000000e+00> : vector<8x128xf32>
    %282 = tpu.matmul %280, %281, %cst_111 {dimension_numbers = #tpu.dot_dimension_numbers<[1], [0], [0], [1], [0, 0, 1, 1], [], []>} : vector<8x32xbf16>, vector<32x128xbf16>, vector<8x128xf32> -> vector<8x128xf32>
    %c0_112 = arith.constant 0 : index
    %c0_113 = arith.constant 0 : index
    %283 = vector.load %arg20[%c0_112, %c0_113] : memref<1x128xf32, #tpu.memory_space<vmem>>, vector<1x128xf32>
    %284 = vector.broadcast %283 : vector<1x128xf32> to vector<8x128xf32>
    %285 = arith.addf %282, %284 : vector<8x128xf32>
    %cst_114 = arith.constant 0.000000e+00 : f32
    %286 = vector.broadcast %cst_114 : f32 to vector<8x128xf32>
    %287 = arith.maximumf %285, %286 : vector<8x128xf32>
    %288 = arith.truncf %287 : vector<8x128xf32> to vector<8x128xbf16>
    %c0_115 = arith.constant 0 : index
    %c0_116 = arith.constant 0 : index
    %289 = vector.load %arg21[%c0_115, %c0_116] : memref<128x32xbf16, #tpu.memory_space<vmem>>, vector<128x32xbf16>
    %cst_117 = arith.constant dense<0.000000e+00> : vector<8x32xf32>
    %290 = tpu.matmul %288, %289, %cst_117 {dimension_numbers = #tpu.dot_dimension_numbers<[1], [0], [0], [1], [0, 0, 1, 1], [], []>} : vector<8x128xbf16>, vector<128x32xbf16>, vector<8x32xf32> -> vector<8x32xf32>
    %c0_118 = arith.constant 0 : index
    %c0_119 = arith.constant 0 : index
    %291 = vector.load %arg22[%c0_118, %c0_119] : memref<1x32xf32, #tpu.memory_space<vmem>>, vector<1x32xf32>
    %292 = vector.broadcast %291 : vector<1x32xf32> to vector<8x32xf32>
    %293 = arith.addf %290, %292 : vector<8x32xf32>
    %294 = arith.addf %257, %293 : vector<8x32xf32>
    %c0_120 = arith.constant 0 : index
    %c0_121 = arith.constant 0 : index
    %c0_122 = arith.constant 0 : index
    %295 = vector.load %arg23[%c0_120, %c0_121, %c0_122] : memref<1x8x32xf32, #tpu.memory_space<vmem>>, vector<1x8x32xf32>
    %296 = vector.shape_cast %295 : vector<1x8x32xf32> to vector<8x32xf32>
    %297 = vector.shape_cast %294 : vector<8x32xf32> to vector<1x8x32xf32>
    tpu.vector_store %arg23[%c0_120, %c0_121, %c0_122], %297 {strides = array<i32>} : memref<1x8x32xf32, #tpu.memory_space<vmem>>, vector<1x8x32xf32>,
    return
  }
  func.func @transform_0(%arg0: i32) -> (i32, i32, i32) {
    %c0_i32 = arith.constant 0 : i32
    %c0_i32_0 = arith.constant 0 : i32
    %c0_i32_1 = arith.constant 0 : i32
    return %arg0, %c0_i32, %c0_i32_0 : i32, i32, i32
  }
  func.func @transform_1(%arg0: i32) -> (i32, i32, i32) {
    %c0_i32 = arith.constant 0 : i32
    %c0_i32_0 = arith.constant 0 : i32
    %c0_i32_1 = arith.constant 0 : i32
    return %arg0, %c0_i32, %c0_i32_0 : i32, i32, i32
  }
  func.func @transform_2(%arg0: i32) -> (i32, i32) {
    %c0_i32 = arith.constant 0 : i32
    %c0_i32_0 = arith.constant 0 : i32
    %c0_i32_1 = arith.constant 0 : i32
    return %c0_i32, %c0_i32_0 : i32, i32
  }
  func.func @transform_3(%arg0: i32) -> (i32, i32) {
    %c0_i32 = arith.constant 0 : i32
    %c0_i32_0 = arith.constant 0 : i32
    %c0_i32_1 = arith.constant 0 : i32
    return %c0_i32, %c0_i32_0 : i32, i32
  }
  func.func @transform_4(%arg0: i32) -> (i32, i32) {
    %c0_i32 = arith.constant 0 : i32
    %c0_i32_0 = arith.constant 0 : i32
    %c0_i32_1 = arith.constant 0 : i32
    return %c0_i32, %c0_i32_0 : i32, i32
  }
  func.func @transform_5(%arg0: i32) -> (i32, i32) {
    %c0_i32 = arith.constant 0 : i32
    %c0_i32_0 = arith.constant 0 : i32
    %c0_i32_1 = arith.constant 0 : i32
    return %c0_i32, %c0_i32_0 : i32, i32
  }
  func.func @transform_6(%arg0: i32) -> (i32, i32) {
    %c0_i32 = arith.constant 0 : i32
    %c0_i32_0 = arith.constant 0 : i32
    %c0_i32_1 = arith.constant 0 : i32
    return %c0_i32, %c0_i32_0 : i32, i32
  }
  func.func @transform_7(%arg0: i32) -> (i32, i32) {
    %c0_i32 = arith.constant 0 : i32
    %c0_i32_0 = arith.constant 0 : i32
    %c0_i32_1 = arith.constant 0 : i32
    return %c0_i32, %c0_i32_0 : i32, i32
  }
  func.func @transform_8(%arg0: i32) -> (i32, i32) {
    %c0_i32 = arith.constant 0 : i32
    %c0_i32_0 = arith.constant 0 : i32
    %c0_i32_1 = arith.constant 0 : i32
    return %c0_i32, %c0_i32_0 : i32, i32
  }
  func.func @transform_9(%arg0: i32) -> (i32, i32) {
    %c0_i32 = arith.constant 0 : i32
    %c0_i32_0 = arith.constant 0 : i32
    %c0_i32_1 = arith.constant 0 : i32
    return %c0_i32, %c0_i32_0 : i32, i32
  }
  func.func @transform_10(%arg0: i32) -> (i32, i32) {
    %c0_i32 = arith.constant 0 : i32
    %c0_i32_0 = arith.constant 0 : i32
    %c0_i32_1 = arith.constant 0 : i32
    return %c0_i32, %c0_i32_0 : i32, i32
  }
  func.func @transform_11(%arg0: i32) -> (i32, i32) {
    %c0_i32 = arith.constant 0 : i32
    %c0_i32_0 = arith.constant 0 : i32
    %c0_i32_1 = arith.constant 0 : i32
    return %c0_i32, %c0_i32_0 : i32, i32
  }
  func.func @transform_12(%arg0: i32) -> (i32, i32) {
    %c0_i32 = arith.constant 0 : i32
    %c0_i32_0 = arith.constant 0 : i32
    %c0_i32_1 = arith.constant 0 : i32
    return %c0_i32, %c0_i32_0 : i32, i32
  }
  func.func @transform_13(%arg0: i32) -> (i32, i32) {
    %c0_i32 = arith.constant 0 : i32
    %c0_i32_0 = arith.constant 0 : i32
    %c0_i32_1 = arith.constant 0 : i32
    return %c0_i32, %c0_i32_0 : i32, i32
  }
  func.func @transform_14(%arg0: i32) -> (i32, i32) {
    %c0_i32 = arith.constant 0 : i32
    %c0_i32_0 = arith.constant 0 : i32
    %c0_i32_1 = arith.constant 0 : i32
    return %c0_i32, %c0_i32_0 : i32, i32
  }
  func.func @transform_15(%arg0: i32) -> (i32, i32) {
    %c0_i32 = arith.constant 0 : i32
    %c0_i32_0 = arith.constant 0 : i32
    %c0_i32_1 = arith.constant 0 : i32
    return %c0_i32, %c0_i32_0 : i32, i32
  }
  func.func @transform_16(%arg0: i32) -> (i32, i32) {
    %c0_i32 = arith.constant 0 : i32
    %c0_i32_0 = arith.constant 0 : i32
    %c0_i32_1 = arith.constant 0 : i32
    return %c0_i32, %c0_i32_0 : i32, i32
  }
  func.func @transform_17(%arg0: i32) -> (i32, i32) {
    %c0_i32 = arith.constant 0 : i32
    %c0_i32_0 = arith.constant 0 : i32
    %c0_i32_1 = arith.constant 0 : i32
    return %c0_i32, %c0_i32_0 : i32, i32
  }
  func.func @transform_18(%arg0: i32) -> (i32, i32) {
    %c0_i32 = arith.constant 0 : i32
    %c0_i32_0 = arith.constant 0 : i32
    %c0_i32_1 = arith.constant 0 : i32
    return %c0_i32, %c0_i32_0 : i32, i32
  }
  func.func @transform_19(%arg0: i32) -> (i32, i32) {
    %c0_i32 = arith.constant 0 : i32
    %c0_i32_0 = arith.constant 0 : i32
    %c0_i32_1 = arith.constant 0 : i32
    return %c0_i32, %c0_i32_0 : i32, i32
  }
  func.func @transform_20(%arg0: i32) -> (i32, i32) {
    %c0_i32 = arith.constant 0 : i32
    %c0_i32_0 = arith.constant 0 : i32
    %c0_i32_1 = arith.constant 0 : i32
    return %c0_i32, %c0_i32_0 : i32, i32
  }
  func.func @transform_21(%arg0: i32) -> (i32, i32) {
    %c0_i32 = arith.constant 0 : i32
    %c0_i32_0 = arith.constant 0 : i32
    %c0_i32_1 = arith.constant 0 : i32
    return %c0_i32, %c0_i32_0 : i32, i32
  }
  func.func @transform_22(%arg0: i32) -> (i32, i32, i32) {
    %c0_i32 = arith.constant 0 : i32
    %c0_i32_0 = arith.constant 0 : i32
    %c0_i32_1 = arith.constant 0 : i32
    return %arg0, %c0_i32, %c0_i32_0 : i32, i32, i32
  }
}

</mosaic_0001>

<bundles_post_ra>
// kernel: transformer_decoder_cell.1
= control target key start
LH: loop header
LB: loop body
LE: loop exit
PB: predicated region body
PF: predicated region fallthrough
CT: control target
= control target key end

     0   :  { %s3149_s0 = inlined_call_operand.vmem [shape: f32[2,8,32], index: 0, kind: input, shape index: {}]   ;;  %s3150_s1 = inlined_call_operand.vmem [shape: f32[2,8,32], index: 1, kind: input, shape index: {}]   ;;  %s3151_s2 = inlined_call_operand.vmem [shape: f32[1,32], index: 2, kind: input, shape index: {}]   ;;  %s3152_s3 = inlined_call_operand.vmem [shape: f32[1,32], index: 3, kind: input, shape index: {}]   ;;  %s3153_s4 = inlined_call_operand.vmem [shape: bf16[32,96], index: 4, kind: input, shape index: {}]   ;;  %s3154_s5 = inlined_call_operand.vmem [shape: f32[1,96], index: 5, kind: input, shape index: {}]   ;;  %s3155_s6 = inlined_call_operand.vmem [shape: bf16[32,32], index: 6, kind: input, shape index: {}]   ;;  %s3156_s7 = inlined_call_operand.hbm [shape: f32[1,32], index: 7, kind: input, shape index: {}]   ;;  %s3157_s8 = inlined_call_operand.vmem [shape: f32[1,32], index: 8, kind: input, shape index: {}]   ;;  %s3158_s9 = inlined_call_operand.vmem [shape: f32[1,32], index: 9, kind: input, shape index: {}]   ;;  %s3159_s10 = inlined_call_operand.vmem [shape: bf16[32,32], index: 10, kind: input, shape index: {}]   ;;  %s3160_s11 = inlined_call_operand.hbm [shape: f32[1,32], index: 11, kind: input, shape index: {}]   ;;  %s3161_s12 = inlined_call_operand.hbm [shape: bf16[32,64], index: 12, kind: input, shape index: {}]   ;;  %s3162_s13 = inlined_call_operand.hbm [shape: f32[1,64], index: 13, kind: input, shape index: {}]   ;;  %s3163_s14 = inlined_call_operand.hbm [shape: bf16[32,32], index: 14, kind: input, shape index: {}]   ;;  %s3164_s15 = inlined_call_operand.hbm [shape: f32[1,32], index: 15, kind: input, shape index: {}]   ;;  %s3165_s16 = inlined_call_operand.vmem [shape: f32[1,32], index: 16, kind: input, shape index: {}]   ;;  %s3166_s17 = inlined_call_operand.vmem [shape: f32[1,32], index: 17, kind: input, shape index: {}]   ;;  %s3167_s18 = inlined_call_operand.hbm [shape: bf16[32,128], index: 18, kind: input, shape index: {}]   ;;  %s3168_s19 = inlined_call_operand.hbm [shape: f32[1,128], index: 19, kind: input, shape index: {}]   ;;  %s3169_s20 = inlined_call_operand.vmem [shape: bf16[128,32], index: 20, kind: input, shape index: {}]   ;;  %s3170_s21 = inlined_call_operand.hbm [shape: f32[1,32], index: 21, kind: input, shape index: {}]   ;;  %s3171_s22 = inlined_call_operand.hbm [shape: f32[2,8,32], index: 22, kind: output, shape index: {}]  }
   0x1   :  { %3183 = sst [smem:[#allocation32_spill]] %s3149_s0 }
   0x2   :  { %3184 = sst [smem:[#allocation33_spill]] %s3150_s1 }
   0x3   :  { %3185 = sst [smem:[#allocation34_spill]] %s3151_s2 }
   0x4   :  { %3186 = sst [smem:[#allocation35_spill]] %s3152_s3 }
   0x5   :  { %3187 = sst [smem:[#allocation36_spill]] %s3153_s4 }
   0x6   :  { %3188 = sst [smem:[#allocation37_spill]] %s3154_s5 }
   0x7   :  { %3189 = sst [smem:[#allocation38_spill]] %s3155_s6 }
   0x8   :  { %3190 = sst [smem:[#allocation39_spill]] %s3156_s7 }
   0x9   :  { %3191 = sst [smem:[#allocation40_spill]] %s3160_s11 }
   0xa   :  { %3192 = sst [smem:[#allocation41_spill]] %s3162_s13 }
   0xb   :  { %3193 = sst [smem:[#allocation42_spill]] %s3164_s15 }
   0xc   :  { %27 = vsyncpa [#allocation4], 0 }
   0xd   :  { %28 = vsyncpa [#allocation7], 0 }
   0xe   :  { %29 = vsyncpa [#allocation10], 0 }
   0xf   :  { %30 = vsyncpa [#allocation13], 0 }
  0x10   :  { %31 = vsyncpa [#allocation16], 0 }
  0x11   :  { %32 = vsyncpa [#allocation5], 0 }
  0x12   :  { %34 = vsyncpa [#allocation5 + $0x1], 0  ;;  %s2768_s3 = smov 0   ;;  %s2770_s28 = smov 0  }
  0x13   :  { %s2772_s29 = smov 0   ;;  %s2774_s30 = smov 0  }
  0x14 LB: > { %3194 = sst [smem:[#allocation25_spill]] %s2613_s3  ;;  %s2789_s4 = sadd.s32 4294967295, %s2625_s30   ;;  %s2625_s30 = sphi %s2774_s30, %s3221_s30   ;;  %s2621_s29 = sphi %s2772_s29, %s3223_s29   ;;  %s2617_s28 = sphi %s2770_s28, %s3225_s28   ;;  %s2613_s3 = sphi %s2768_s3, %s3224_s3  }
  0x15   : > { %3195 = sst [smem:[#allocation26_spill]] %s2621_s29  ;;  %s1922_s0 = sadd.s32 4294967294, %s2625_s30  }
  0x16   : > { %3196 = sst [smem:[#allocation27_spill]] %s2625_s30  ;;  %s2793_s23 = sadd.s32 1, %s2625_s30  }
  0x17   : > { %3197 = sst [smem:[#allocation28_spill]] %s2793_s23  ;;  %s519_s1 = sadd.s32 1, %s2621_s29 }
  0x18   : > { %s516_s5 = ssub.s32 %s2625_s30, %s2793_s23  ;;  %p529_p0 = scmp.ne.s32.totalorder %s2621_s29, %s2617_s28 }
  0x19   : > { %p517_p1 = scmp.eq.s32.totalorder %s516_s5, 0  ;;  %p530_p2 = scmp.eq.s32.totalorder %s2789_s4, 1 }
  0x1a   : > { %p535_p3 = scmp.ne.s32.totalorder %s2617_s28, %s2613_s3  ;;  %p536_p4 = scmp.eq.s32.totalorder %s1922_s0, 1 }
  0x1b   : > { %s2804_s24 = scalar_select %p517_p1, %s2621_s29, %s519_s1  }
  0x1c   : > { %p2806_p5 = por %p530_p2, %p529_p0  ;;  %p2810_p6 = por %p536_p4, %p535_p3 }
  0x1d   : > { %3198 = sst [smem:[#allocation29_spill]] %s2804_s24  ;;  %p1923_p7 = scmp.ge.s32.totalorder %s2625_s30, 1 }
  0x1e   : > { %s3199_s6 = scalar_select %p2806_p5, 1, 0 }
  0x1f   : > { %s3201_s25 = scalar_select %p2810_p6, 1, 0 }
  0x20   : > { %3200 = sst [smem:[#allocation30_spill]] %s3199_s6  ;;  %p543_p8 = scmp.lt.s32.totalorder %s2625_s30, 3 }
  0x21   : > { %3202 = sst [smem:[#allocation31_spill]] %s3201_s25  ;;  %p2143_p9 = scmp.eq.s32.totalorder %s2789_s4, 0 }
  0x22   : > { %p2817_p10 = pnand %p1923_p7, %p543_p8  ;;  %s3204_s11 = sld [smem:[#allocation40_spill]] }
  0x23   : > { %s2627_s1 = smov [#allocation6]   ;;  %s3205_s13 = sld [smem:[#allocation41_spill]] }
  0x24   : > { %p2111_p11 = pneg %p2817_p10  ;;  %s593_s5 = sshll.u32 %s2627_s1, 4  ;;  %s594_s5 = int_to_ptr.vmem [resolvable:$true] %s593_s5 }
  0x25   : > { %s3207_s15 = sld [smem:[#allocation42_spill]]  ;;  %s2628_s3 = smov [#allocation9]  }
  0x26   : > { %p2831_p12 = pnand %p2143_p9, %p2111_p11  ;;  %s619_s1 = sshll.u32 %s2628_s3, 4  ;;  %s620_s1 = int_to_ptr.vmem [resolvable:$true] %s619_s1 }
  0x27   : > { %s2629_s30 = smov [#allocation12]   ;;  %s2630_s2 = smov [#allocation15]  }
  0x28   : > { %s591_s0 = sshll.u32 %s3204_s11, 4  ;;  %s645_s6 = sshll.u32 %s2629_s30, 4  ;;  %s592_s0 = int_to_ptr.hbm [resolvable:$true] %s591_s0  ;;  %s646_s6 = int_to_ptr.vmem [resolvable:$true] %s645_s6 }
  0x29   : > { %s617_s23 = sshll.u32 %s3205_s13, 4  ;;  %s675_s13 = sshll.u32 %s3168_s19, 4  ;;  %s618_s23 = int_to_ptr.hbm [resolvable:$true] %s617_s23  ;;  %s676_s13 = int_to_ptr.hbm [resolvable:$true] %s675_s13 }
  0x2a   : > { %2117 = dma.hbm_to_vmem [thread:$0]  (!%p2831_p12), %s592_s0, 16, %s594_s5, [#allocation7]  }
  0x2b   : > { %s643_s11 = sshll.u32 %s3207_s15, 4  ;;  %s677_s3 = sshll.u32 %s2630_s2, 4  ;;  %s644_s11 = int_to_ptr.hbm [resolvable:$true] %s643_s11  ;;  %s678_s3 = int_to_ptr.vmem [resolvable:$true] %s677_s3 }
  0x2c   : > { %2123 = dma.hbm_to_vmem [thread:$0]  (!%p2831_p12), %s618_s23, 16, %s620_s1, [#allocation10]  }
  0x2d   : > { %2129 = dma.hbm_to_vmem [thread:$0]  (!%p2831_p12), %s644_s11, 16, %s646_s6, [#allocation13]  }
  0x2e   : > { %s3208_s7 = sld [smem:[#allocation39_spill]]  ;;  %s602_s1 = sshll.u32 %s3161_s12, 4  ;;  %s603_s1 = int_to_ptr.hbm [resolvable:$true] %s602_s1 }
  0x2f   : > { %2135 = dma.hbm_to_vmem [thread:$0]  (!%p2831_p12), %s676_s13, 16, %s678_s3, [#allocation16]  }
  0x30   : > { %s2631_s30 = smov [#allocation3]   ;;  %s2632_s11 = smov [#allocation8]  }
  0x31   : > { %s572_s29 = sshll.u32 %s2631_s30, 4  ;;  %s604_s6 = sshll.u32 %s2632_s11, 4  ;;  %s573_s29 = int_to_ptr.vmem [resolvable:$true] %s572_s29  ;;  %s605_s6 = int_to_ptr.vmem [resolvable:$true] %s604_s6 }
  0x32   : > { %s2633_s15 = smov 64   ;;  %s2634_s24 = smov 4  }
  0x33   : > { %2120 = dma.hbm_to_vmem [thread:$0]  (!%p2831_p12), %s603_s1, 256, %s605_s6, [#allocation7], %s2633_s15, %s2633_s15, %s2634_s24  }
  0x34   : > { %s570_s0 = sshll.u32 %s3208_s7, 4  ;;  %s628_s3 = sshll.u32 %s3163_s14, 4  ;;  %s571_s0 = int_to_ptr.hbm [resolvable:$true] %s570_s0  ;;  %s629_s3 = int_to_ptr.hbm [resolvable:$true] %s628_s3 }
  0x35   : > { %2114 = dma.hbm_to_vmem [thread:$0]  (!%p2831_p12), %s571_s0, 16, %s573_s29, [#allocation4]  }
  0x36   : > { %s2635_s27 = smov [#allocation11]   ;;  %s660_s0 = sshll.u32 %s3167_s18, 4  ;;  %s661_s0 = int_to_ptr.hbm [resolvable:$true] %s660_s0 }
  0x37   : > { %s630_s23 = sshll.u32 %s2635_s27, 4  ;;  %s2636_s29 = smov [#allocation14]   ;;  %s631_s23 = int_to_ptr.vmem [resolvable:$true] %s630_s23 }
  0x38   : > { %2126 = dma.hbm_to_vmem [thread:$0]  (!%p2831_p12), %s629_s3, 256, %s631_s23, [#allocation10], %s2633_s15, %s2633_s15, %s2634_s24  }
  0x39   : > { %s662_s11 = sshll.u32 %s2636_s29, 4  ;;  %s690_s6 = sshll.u32 %s3170_s21, 4  ;;  %s663_s11 = int_to_ptr.vmem [resolvable:$true] %s662_s11  ;;  %s691_s6 = int_to_ptr.hbm [resolvable:$true] %s690_s6 }
  0x3a   : > { %2132 = dma.hbm_to_vmem [thread:$0]  (!%p2831_p12), %s661_s0, 256, %s663_s11, [#allocation13], %s2633_s15, %s2633_s15, %s2634_s24  }
  0x3b   : > { %s2637_s13 = smov [#allocation17]   ;;  %719 = sbr.rel (%p2817_p10) target bundleno = 3255 (0xcb7), region = 108 }
  0x3c   : > { %s692_s2 = sshll.u32 %s2637_s13, 4  ;;  %s693_s2 = int_to_ptr.vmem [resolvable:$true] %s692_s2 }
  0x3d   : > { %2138 = dma.hbm_to_vmem [thread:$0]  (!%p2831_p12), %s691_s6, 16, %s693_s2, [#allocation16]  }
  0x40   : > { %2588 = dma.done.wait (%p2143_p9), [#allocation4], 16  }
  0x41   : > { %2590 = vsyncadd (%p2143_p9), [#allocation4], 4294967280 }
  0x42   : > { %2592 = dma.done.wait (%p2143_p9), [#allocation7], 272  }
  0x43   : > { %2594 = vsyncadd (%p2143_p9), [#allocation7], 4294967024 }
  0x44   : > { %2596 = dma.done.wait (%p2143_p9), [#allocation10], 272  }
  0x45   : > { %2598 = vsyncadd (%p2143_p9), [#allocation10], 4294967024 }
  0x46   : > { %2600 = dma.done.wait (%p2143_p9), [#allocation13], 272  }
  0x47   : > { %2602 = vsyncadd (%p2143_p9), [#allocation13], 4294967024 }
  0x48   : > { %2604 = dma.done.wait (%p2143_p9), [#allocation16], 32  }
  0x49   : > { %2606 = vsyncadd (%p2143_p9), [#allocation16], 4294967264  ;;  %p825_p13 = scmp.lt.s32.totalorder %s2789_s4, 1  ;;  %s3209_s24 = sld [smem:[#allocation32_spill]]  ;;  %vm837_vm0 = vcmask 261120   ;;  %v2638_v2 = vmov 32.0   ;;  %v912_v48 = vlaneseq }
  0x4a   : > { %2233 = vrcp.f32 %v2638_v2  ;;  %s3210_s5 = sld [smem:[#allocation36_spill]]  ;;  %s2640_s27 = smov 120   ;;  %vm921_vm5 = vcmask 64512   ;;  %vm959_vm7 = vcmask 1043456   ;;  %vm1038_vm8 = vcmask 130112  }
  0x4b   : > { %s2898_s7 = scalar_select %p825_p13, %s2789_s4, 1  ;;  %v913_v49 = vshrl.u32 %v912_v48, 7  ;;  %v915_v50 = vand.u32 127, %v912_v48  ;;  %vm1101_vm9 = vcmask 195712   ;;  %vm1164_vm10 = vcmask 261312  }
  0x4c   : > { %s3211_s1 = sld [smem:[#allocation34_spill]]  ;;  %s2641_s23 = smov 96  }
  0x4d   : > { %s1945_s25 = sshll.u32 %s2898_s7, 3  ;;  %s3212_s2 = sld [smem:[#allocation35_spill]]  ;;  %vm916_vm6 = vcmp.gt.s32.totalorder %v915_v50, %v913_v49 }
  0x4e   : > { %s3182_s30 = smov 72   ;;  %s2643_s0 = smov 88  }
  0x4f   : > { %s828_s3 = scalar_lea.vmem %s3209_s24, %s1945_s25  ;;  %s3213_s24 = sld [smem:[#allocation37_spill]] }
  0x50   : > { %v2906_v0 = vld [vmem:[%s828_s3] sm:$0xff]  ;;  %v2234_v3 = vpop.eup %2233  ;;  %v2054_v14 = vld [vmem:[%s3210_s5 + $0x8] sm:$0xff]  ;;  %s2639_s3 = smov 104   ;;  %s2644_s29 = smov 112  }
  0x51   : > { %v838_v1 = vsel %vm837_vm0, %v2906_v0, 0.0  ;;  %v842_v4 = vmul.f32 32.0, %v2234_v3  ;;  %vm846_vm1 = vweird.f32 %v2234_v3  ;;  %905 = vmatpush.bf16.msra.mxu0 %v2054_v14  ;;  %v2053_v15 = vld [vmem:[%s3210_s5] sm:$0xff]  ;;  %s2645_s11 = smov 80   ;;  %s2647_s6 = smov 56  }
  0x52   : > { %839 = vadd.xlane.f32.xlu0 %v838_v1  ;;  %v2220_v25 = vld [vmem:[%s3211_s1] ss:$0 sm:$0xff]  ;;  %s2646_s1 = smov 64   ;;  %s2648_s13 = smov 40  }
  0x53   : > { %v843_v5 = vsub.f32 1.0, %v842_v4  ;;  %v2221_v28 = vld [vmem:[%s3212_s2] ss:$0 sm:$0xff]  ;;  %s2649_s2 = smov 48   ;;  %s2650_s26 = smov 8  }
  0x54   : > { %s2651_s15 = smov 24  }
  0x55   : > { %v844_v6 = vmul.f32 %v2234_v3, %v843_v5  ;;  %906 = vmatpush.bf16.msra.mxu0 %v2053_v15  ;;  %v2222_v32 = vld [vmem:[%s3213_s24] ss:$0 sm:$0xff]  ;;  %s2652_s24 = smov 16  }
  0x57   : > { %v845_v7 = vadd.f32 %v2234_v3, %v844_v6 }
  0x59   : > { %v2910_v8 = vsel %vm846_vm1, %v2234_v3, %v845_v7 }
  0xc5   : > { %v840_v9 = vpop.xlane.xlu0 %839 }
  0xc6   : > { %v848_v10 = vmul.f32 %v2910_v8, %v840_v9 }
  0xc8   : > { %v849_v11 = vsub.f32 %v2906_v0, %v848_v10 }
  0xca   : > { %v850_v12 = vmul.f32 %v849_v11, %v849_v11 }
  0xcc   : > { %v851_v13 = vsel %vm837_vm0, %v850_v12, 0.0 }
  0xcd   : > { %852 = vadd.xlane.f32.xlu0 %v851_v13 }
 0x140   : > { %v853_v16 = vpop.xlane.xlu0 %852 }
 0x141   : > { %v854_v17 = vmul.f32 %v853_v16, %v2910_v8 }
 0x143   : > { %v855_v18 = vadd.f32 1e-05, %v854_v17 }
 0x145   : > { %2235 = vrsqrt.f32 %v855_v18  ;;  %vm862_vm3 = vweird.f32 %v855_v18 }
 0x14b   : > { %v2236_v19 = vpop.eup %2235 }
 0x14c   : > { %v857_v20 = vmul.f32 %v2236_v19, %v855_v18  ;;  %vm863_vm2 = vweird.f32 %v2236_v19 }
 0x14d   : > { %vm864_vm4 = vmor %vm862_vm3, %vm863_vm2 }
 0x14e   : > { %v858_v21 = vmul.f32 %v2236_v19, %v857_v20 }
 0x150   : > { %v859_v22 = vmul.f32 0.5, %v858_v21 }
 0x152   : > { %v860_v23 = vsub.f32 1.5, %v859_v22 }
 0x154   : > { %v861_v24 = vmul.f32 %v2236_v19, %v860_v23 }
 0x156   : > { %v865_v26 = vsel %vm864_vm4, %v2236_v19, %v861_v24 }
 0x157   : > { %v866_v27 = vmul.f32 %v865_v26, %v849_v11 }
 0x159   : > { %v870_v29 = vmul.f32 %v2220_v25, %v866_v27 }
 0x15b   : > { %v874_v30 = vadd.f32 %v2221_v28, %v870_v29 }
 0x15d   : > { %v875_v31 = vpack.c.bf16 %v874_v30, %v874_v30 }
 0x15f   : > { %1955 = vmatmul.msk.bf16.vlgmr.msra.gmra.mxu0 %vm837_vm0, %v875_v31 }
 0x1dc   : > { %v908_v33 = vpop.f32.mrf.mxu0 }
 0x1dd   : > { %v909_v34 = vadd.f32 %v2222_v32, %v908_v33 }
 0x1df   : > { %v2932_v35 = vpack.c.bf16 %v909_v34, %v909_v34 }
 0x1e1   : > { %1103 = vrot.lane.b32.xlu0 %v2932_v35, %s2639_s3  ;;  %977 = vrot.lane.b32.xlu2 %v2932_v35, %s2640_s27 }
 0x1e2   : > { %919 = vrot.lane.b32.xlu1 %v2932_v35, %s2641_s23 }
 0x1e4   : > { %v910_v36 = vpop.f32.mrf.mxu0 }
 0x1e9   : > { %1105 = vrot.lane.b32.xlu2 %v2932_v35, %s3182_s30 }
 0x1ea   : > { %979 = vrot.lane.b32.xlu1 %v2932_v35, %s2643_s0 }
 0x1f1   : > { %1040 = vrot.lane.b32.xlu2 %v2932_v35, %s2644_s29 }
 0x1f2   : > { %1042 = vrot.lane.b32.xlu1 %v2932_v35, %s2645_s11 }
 0x23b   : > { %v978_v37 = vpop.permute.xlu2 %977 }
 0x243   : > { %v1106_v40 = vpop.permute.xlu2 %1105 }
 0x244   : > { %v1111_v43 = vsel %vm921_vm5, %v1106_v40, 0 }
 0x24b   : > { %v1041_v46 = vpop.permute.xlu2 %1040 }
 0x253   : > { %v1104_v47 = vpop.permute.xlu0 %1103 }
 0x254   : > { %v920_v38 = vpop.permute.xlu1 %919 }
 0x255   : > { %v926_v39 = vsel %vm921_vm5, %v920_v38, 0 }
 0x256   : > { %935 = vmatpush.bf16.xpose.msra.mxu3 %v926_v39 }
 0x25c   : > { %v980_v41 = vpop.permute.xlu1 %979 }
 0x25d   : > { %1956 = vmatmul.msk.bf16.vlgmr.msra.gmra.mxu3 %vm921_vm5, %v2932_v35  ;;  %v985_v42 = vsel %vm921_vm5, %v980_v41, 0 }
 0x25e   : > { %994 = vmatpush.bf16.xpose.msrb.mxu3 %v985_v42 }
 0x264   : > { %v1043_v44 = vpop.permute.xlu1 %1042 }
 0x265   : > { %v1048_v45 = vsel %vm921_vm5, %v1043_v44, 0 }
 0x266   : > { %1120 = vmatpush.bf16.xpose.msra.mxu3 %v1111_v43  ;;  %1057 = vmatpush.bf16.xpose.msrb.mxu0 %v1048_v45 }
 0x26d   : > { %1958 = vmatmul.msk.bf16.vlgmr.msrb.gmra.mxu3 %vm921_vm5, %v978_v37  ;;  %1960 = vmatmul.msk.bf16.vlgmr.msrb.gmra.mxu0 %vm921_vm5, %v1041_v46 }
 0x27d   : > { %1962 = vmatmul.msk.bf16.vlgmr.msra.gmra.mxu3 %vm921_vm5, %v1104_v47 }
 0x2e0   : > { %v937_v51 = vpop.f32.mrf.mxu3 }
 0x2e1   : > { %v941_v52 = vsel %vm916_vm6, -1000000.0, %v937_v51 }
 0x2e2   : > { %v942_v53 = vsel %vm921_vm5, %v941_v52, -inf }
 0x2e3   : > { %943 = vmax.xlane.f32.xlu1 %v942_v53 }
 0x2e8   : > { %v939_v54 = vpop.f32.mrf.mxu3 }
 0x2ea   : > { %v1059_v55 = vpop.f32.mrf.mxu0 }
 0x2eb   : > { %v1063_v60 = vsel %vm916_vm6, -1000000.0, %v1059_v55 }
 0x2ec   : > { %v1064_v62 = vsel %vm921_vm5, %v1063_v60, -inf }
 0x2f0   : > { %v996_v56 = vpop.f32.mrf.mxu3 }
 0x2f1   : > { %v1000_v57 = vsel %vm916_vm6, -1000000.0, %v996_v56 }
 0x2f2   : > { %v1061_v58 = vpop.f32.mrf.mxu0  ;;  %v1001_v59 = vsel %vm921_vm5, %v1000_v57, -inf }
 0x2f3   : > { %1002 = vmax.xlane.f32.xlu2 %v1001_v59 }
 0x2f8   : > { %v998_v61 = vpop.f32.mrf.mxu3 }
 0x2fb   : > { %1065 = vmax.xlane.f32.xlu2 %v1064_v62 }
 0x300   : > { %v1122_v63 = vpop.f32.mrf.mxu3 }
 0x301   : > { %v1126_v1 = vsel %vm916_vm6, -1000000.0, %v1122_v63 }
 0x302   : > { %v1127_v2 = vsel %vm921_vm5, %v1126_v1, -inf }
 0x303   : > { %1128 = vmax.xlane.f32.xlu0 %v1127_v2 }
 0x308   : > { %v1124_v3 = vpop.f32.mrf.mxu3 }
 0x313   : > { %954 = vrot.lane.b32.xlu2 %v2932_v35, %s2646_s1 }
 0x317   : > { %1013 = vrot.lane.b32.xlu0 %v2932_v35, %s2647_s6  ;;  %s3215_s6 = sld [smem:[#allocation33_spill]] }
 0x31b   : > { %1139 = vrot.lane.b32.xlu2 %v2932_v35, %s2648_s13  ;;  %s3214_s13 = sld [smem:[#allocation38_spill]] }
 0x31f   : > { %1076 = vrot.lane.b32.xlu0 %v2932_v35, %s2649_s2  ;;  %s832_s2 = scalar_lea.vmem %s3215_s6, %s1945_s25 }
 0x321   : > { %v2055_v58 = vld [vmem:[%s3214_s13] sm:$0xff] }
 0x356   : > { %v944_v4 = vpop.xlane.xlu1 %943 }
 0x357   : > { %v945_v5 = vsub.f32 %v941_v52, %v944_v4 }
 0x359   : > { %v946_v6 = vmul.f32 1.442695, %v945_v5 }
 0x35b   : > { %2237 = vpow2.f32 %v946_v6 }
 0x361   : > { %v2238_v7 = vpop.eup %2237 }
 0x362   : > { %v948_v9 = vsel %vm921_vm5, %v2238_v7, 0.0 }
 0x363   : > { %949 = vadd.xlane.f32.xlu1 %v948_v9  ;;  %v1275_v9 = vld [vmem:[%s832_s2] sm:$0xff] }
 0x366   : > { %v1003_v10 = vpop.xlane.xlu2 %1002 }
 0x367   : > { %v1004_v11 = vsub.f32 %v1000_v57, %v1003_v10  ;;  %v2056_v57 = vld [vmem:[%s3214_s13 + $0x8] sm:$0xff] }
 0x368   : > { %1193 = vmatpush.bf16.msra.mxu0 %v2056_v57  ;;  %v2059_v10 = vld [vmem:[#allocation8] sm:$0xff] }
 0x369   : > { %v1005_v12 = vmul.f32 1.442695, %v1004_v11  ;;  %v1276_v11 = vpack.c.bf16 %v1275_v9, %v1275_v9 }
 0x36b   : > { %2239 = vpow2.f32 %v1005_v12 }
 0x36c   : > { %1194 = vmatpush.bf16.msra.mxu0 %v2055_v58 }
 0x36e   : > { %v1066_v13 = vpop.xlane.xlu2 %1065 }
 0x36f   : > { %v1067_v20 = vsub.f32 %v1063_v60, %v1066_v13 }
 0x371   : > { %v2240_v14 = vpop.eup %2239  ;;  %v1068_v22 = vmul.f32 1.442695, %v1067_v20 }
 0x372   : > { %v1007_v15 = vsel %vm921_vm5, %v2240_v14, 0.0 }
 0x373   : > { %1008 = vadd.xlane.f32.xlu1 %v1007_v15 }
 0x376   : > { %v1129_v16 = vpop.xlane.xlu0 %1128  ;;  %v955_v17 = vpop.permute.xlu2 %954 }
 0x377   : > { %v1130_v18 = vsub.f32 %v1126_v1, %v1129_v16  ;;  %v961_v19 = vsel %vm959_vm7, %v955_v17, 0  ;;  %v2223_v1 = vld [vmem:[#allocation3] ss:$0 sm:$0xff]  ;;  %v2057_v17 = vld [vmem:[%s3159_s10] sm:$0xff] }
 0x378   : > { %970 = vmatpush.bf16.msra.mxu2 %v961_v19  ;;  %v2058_v16 = vld [vmem:[%s3159_s10 + $0x8] sm:$0xff] }
 0x379   : > { %v1131_v21 = vmul.f32 1.442695, %v1130_v18  ;;  %v2226_v18 = vld [vmem:[#allocation9] ss:$0 sm:$0xff] }
 0x37b   : > { %2241 = vpow2.f32 %v1131_v21 }
 0x37c   : > { %2243 = vpow2.f32 %v1068_v22 }
 0x37e   : > { %v1140_v34 = vpop.permute.xlu2 %1139 }
 0x37f   : > { %v1145_v36 = vsel %vm959_vm7, %v1140_v34, 0 }
 0x381   : > { %v2242_v23 = vpop.eup %2241 }
 0x382   : > { %v1133_v24 = vsel %vm921_vm5, %v2242_v23, 0.0  ;;  %v2244_v25 = vpop.eup %2243 }
 0x383   : > { %1134 = vadd.xlane.f32.xlu1 %v1133_v24  ;;  %v1070_v28 = vsel %vm921_vm5, %v2244_v25, 0.0 }
 0x389   : > { %v1014_v26 = vpop.permute.xlu0 %1013 }
 0x38a   : > { %v1019_v27 = vsel %vm959_vm7, %v1014_v26, 0 }
 0x38b   : > { %1028 = vmatpush.bf16.msrb.mxu2 %v1019_v27  ;;  %1071 = vadd.xlane.f32.xlu1 %v1070_v28 }
 0x391   : > { %v1077_v29 = vpop.permute.xlu0 %1076 }
 0x392   : > { %v1082_v30 = vsel %vm959_vm7, %v1077_v29, 0 }
 0x393   : > { %1091 = vmatpush.bf16.msra.mxu1 %v1082_v30 }
 0x397   : > { %1268 = vmatpush.bf16.msrb.mxu1 %v2058_v16 }
 0x39b   : > { %1269 = vmatpush.bf16.msrb.mxu1 %v2057_v17 }
 0x3d6   : > { %v950_v31 = vpop.xlane.xlu1 %949 }
 0x3d7   : > { %2245 = vrcp.f32 %v950_v31 }
 0x3dd   : > { %v2246_v32 = vpop.eup %2245 }
 0x3de   : > { %v952_v33 = vmul.f32 %v2246_v32, %v2238_v7  ;;  %v2060_v7 = vld [vmem:[#allocation8 + $0x8] sm:$0xff] }
 0x3df   : > { %1306 = vmatpush.bf16.msrb.mxu3 %v2060_v7 }
 0x3e0   : > { %v953_v35 = vpack.c.bf16 %v952_v33, %v952_v33  ;;  %v2224_v33 = vld [vmem:[%s3157_s8] ss:$0 sm:$0xff] }
 0x3e2   : > { %1957 = vmatmul.msk.bf16.vlgmr.msra.gmra.mxu2 %vm921_vm5, %v953_v35 }
 0x3e3   : > { %1154 = vmatpush.bf16.msra.mxu2 %v1145_v36  ;;  %1307 = vmatpush.bf16.msrb.mxu3 %v2059_v10  ;;  %v2225_v36 = vld [vmem:[%s3158_s9] ss:$0 sm:$0xff] }
 0x3e6   : > { %v1009_v37 = vpop.xlane.xlu1 %1008  ;;  %1990 = vmatmul.msk.bf16.vlgmr.msrb.gmra.mxu3 %vm837_vm0, %v1276_v11 }
 0x3e7   : > { %2247 = vrcp.f32 %v1009_v37 }
 0x3ed   : > { %v2248_v38 = vpop.eup %2247 }
 0x3ee   : > { %v1011_v39 = vmul.f32 %v2248_v38, %v2240_v14 }
 0x3f0   : > { %v1012_v40 = vpack.c.bf16 %v1011_v39, %v1011_v39 }
 0x3f2   : > { %1959 = vmatmul.msk.bf16.vlgmr.msrb.gmra.mxu2 %vm921_vm5, %v1012_v40 }
 0x3f6   : > { %v1135_v41 = vpop.xlane.xlu1 %1134 }
 0x3f7   : > { %2249 = vrcp.f32 %v1135_v41 }
 0x3fd   : > { %v2250_v42 = vpop.eup %2249 }
 0x3fe   : > { %v1137_v43 = vmul.f32 %v2250_v42, %v2242_v23  ;;  %v1072_v44 = vpop.xlane.xlu1 %1071  ;;  %v2227_v42 = vld [vmem:[#allocation6] ss:$0 sm:$0xff] }
 0x3ff   : > { %2251 = vrcp.f32 %v1072_v44 }
 0x400   : > { %v1138_v45 = vpack.c.bf16 %v1137_v43, %v1137_v43 }
 0x402   : > { %1963 = vmatmul.msk.bf16.vlgmr.msra.gmra.mxu2 %vm921_vm5, %v1138_v45 }
 0x405   : > { %v2252_v46 = vpop.eup %2251 }
 0x406   : > { %v1074_v47 = vmul.f32 %v2252_v46, %v2244_v25 }
 0x408   : > { %v1075_v48 = vpack.c.bf16 %v1074_v47, %v1074_v47 }
 0x40a   : > { %1961 = vmatmul.msk.bf16.vlgmr.msra.gmra.mxu1 %vm921_vm5, %v1075_v48 }
 0x465   : > { %v972_v49 = vpop.f32.mrf.mxu2 }
 0x466   : > { %976 = vst.msk [vmem:[#allocation2] sm:$0xff] %vm921_vm5, %v972_v49 }
 0x469   : > { %v1309_v19 = vpop.f32.mrf.mxu3 }
 0x46a   : > { %v1310_v22 = vadd.f32 %v2226_v18, %v1309_v19 }
 0x46c   : > { %v3016_v24 = vpack.c.bf16 %v1310_v22, %v1310_v22 }
 0x46d   : > { %v974_v50 = vpop.f32.mrf.mxu2 }
 0x46e   : > { %v1319_v25 = vsel %vm921_vm5, %v3016_v24, 0 }
 0x46f   : > { %1328 = vmatpush.bf16.xpose.msrb.mxu2 %v1319_v25 }
 0x471   : > { %v1311_v26 = vpop.f32.mrf.mxu3 }
 0x475   : > { %v1030_v51 = vpop.f32.mrf.mxu2 }
 0x476   : > { %1035 = vrot.lane.b32.xlu1 %v1030_v51, %s2650_s26 }
 0x47d   : > { %v1032_v52 = vpop.f32.mrf.mxu2 }
 0x47e   : > { %1372 = vrot.lane.b32.xlu1 %v3016_v24, %s2640_s27 }
 0x485   : > { %v1156_v53 = vpop.f32.mrf.mxu2 }
 0x486   : > { %1161 = vrot.lane.b32.xlu0 %v1156_v53, %s2651_s15  ;;  %1433 = vrot.lane.b32.xlu1 %v3016_v24, %s2644_s29 }
 0x487   : > { %v1093_v54 = vpop.f32.mrf.mxu1 }
 0x488   : > { %1098 = vrot.lane.b32.xlu2 %v1093_v54, %s2652_s24 }
 0x48d   : > { %v1158_v55 = vpop.f32.mrf.mxu2 }
 0x48f   : > { %v1095_v56 = vpop.f32.mrf.mxu1 }
 0x4e2   : > { %v1099_v60 = vpop.permute.xlu2 %1098 }
 0x4e8   : > { %v1036_v59 = vpop.permute.xlu1 %1035 }
 0x4e9   : > { %1039 = vst.msk [vmem:[#allocation2] sm:$0xff] %vm1038_vm8, %v1036_v59 }
 0x4ea   : > { %1102 = vst.msk [vmem:[#allocation2] sm:$0xff] %vm1101_vm9, %v1099_v60 }
 0x4f0   : > { %v1373_v40 = vpop.permute.xlu1 %1372 }
 0x4f1   : > { %v1378_v41 = vsel %vm921_vm5, %v1373_v40, 0 }
 0x4f2   : > { %1387 = vmatpush.bf16.xpose.msra.mxu1 %v1378_v41 }
 0x4f8   : > { %v1162_v61 = vpop.permute.xlu0 %1161  ;;  %v1434_v43 = vpop.permute.xlu1 %1433 }
 0x4f9   : > { %1165 = vst.msk [vmem:[#allocation2] sm:$0xff] %vm1164_vm10, %v1162_v61  ;;  %v1439_v44 = vsel %vm921_vm5, %v1434_v43, 0 }
 0x4fa   : > { %1448 = vmatpush.bf16.xpose.msra.mxu2 %v1439_v44 }
 0x500   : > { %v1166_v62 = vld [vmem:[#allocation2] sm:$0xff] }
 0x501   : > { %v1167_v63 = vpack.c.bf16 %v1166_v62, %v1166_v62 }
 0x503   : > { %1972 = vmatmul.msk.bf16.vlgmr.msra.gmra.mxu0 %vm837_vm0, %v1167_v63 }
 0x580   : > { %v1196_v2 = vpop.f32.mrf.mxu0 }
 0x581   : > { %v1200_v3 = vadd.f32 %v1196_v2, %v2906_v0 }
 0x583   : > { %v2996_v4 = vadd.f32 %v2223_v1, %v1200_v3 }
 0x585   : > { %v1208_v5 = vsel %vm837_vm0, %v2996_v4, 0.0 }
 0x586   : > { %1209 = vadd.xlane.f32.xlu2 %v1208_v5 }
 0x588   : > { %v1198_v6 = vpop.f32.mrf.mxu0 }
 0x5f9   : > { %v1210_v0 = vpop.xlane.xlu2 %1209 }
 0x5fa   : > { %v1211_v12 = vmul.f32 %v1210_v0, %v2910_v8 }
 0x5fc   : > { %v1212_v13 = vsub.f32 %v2996_v4, %v1211_v12 }
 0x5fe   : > { %v1213_v14 = vmul.f32 %v1212_v13, %v1212_v13 }
 0x600   : > { %v1214_v15 = vsel %vm837_vm0, %v1213_v14, 0.0 }
 0x601   : > { %1215 = vadd.xlane.f32.xlu0 %v1214_v15 }
 0x674   : > { %v1216_v20 = vpop.xlane.xlu0 %1215 }
 0x675   : > { %v1217_v21 = vmul.f32 %v1216_v20, %v2910_v8 }
 0x677   : > { %v1218_v23 = vadd.f32 1e-05, %v1217_v21 }
 0x679   : > { %2253 = vrsqrt.f32 %v1218_v23  ;;  %vm1225_vm12 = vweird.f32 %v1218_v23 }
 0x67f   : > { %v2254_v27 = vpop.eup %2253 }
 0x680   : > { %v1220_v28 = vmul.f32 %v2254_v27, %v1218_v23  ;;  %vm1226_vm11 = vweird.f32 %v2254_v27 }
 0x681   : > { %vm1227_vm13 = vmor %vm1225_vm12, %vm1226_vm11 }
 0x682   : > { %v1221_v29 = vmul.f32 %v2254_v27, %v1220_v28 }
 0x684   : > { %v1222_v30 = vmul.f32 0.5, %v1221_v29 }
 0x686   : > { %v1223_v31 = vsub.f32 1.5, %v1222_v30 }
 0x688   : > { %v1224_v32 = vmul.f32 %v2254_v27, %v1223_v31 }
 0x68a   : > { %v1228_v34 = vsel %vm1227_vm13, %v2254_v27, %v1224_v32 }
 0x68b   : > { %v1229_v35 = vmul.f32 %v1228_v34, %v1212_v13 }
 0x68d   : > { %v1233_v37 = vmul.f32 %v2224_v33, %v1229_v35 }
 0x68f   : > { %v1237_v38 = vadd.f32 %v2225_v36, %v1233_v37 }
 0x691   : > { %v1238_v39 = vpack.c.bf16 %v1237_v38, %v1237_v38 }
 0x693   : > { %1981 = vmatmul.msk.bf16.vlgmr.msrb.gmra.mxu1 %vm837_vm0, %v1238_v39 }
 0x710   : > { %v1271_v45 = vpop.f32.mrf.mxu1 }
 0x711   : > { %v1272_v46 = vadd.f32 %v2227_v42, %v1271_v45 }
 0x713   : > { %v1313_v47 = vpack.c.bf16 %v1272_v46, %v1272_v46 }
 0x715   : > { %1431 = vrot.lane.b32.xlu2 %v1313_v47, %s2644_s29  ;;  %1370 = vrot.lane.b32.xlu1 %v1313_v47, %s2640_s27 }
 0x716   : > { %1991 = vmatmul.msk.bf16.vlgmr.msrb.gmra.mxu2 %vm921_vm5, %v1313_v47 }
 0x718   : > { %v1273_v48 = vpop.f32.mrf.mxu1 }
 0x71d   : > { %1494 = vrot.lane.b32.xlu1 %v3016_v24, %s2639_s3 }
 0x725   : > { %1492 = vrot.lane.b32.xlu1 %v1313_v47, %s2639_s3  ;;  %s3216_s3 = smov 72  }
 0x76f   : > { %v1432_v49 = vpop.permute.xlu2 %1431 }
 0x770   : > { %1995 = vmatmul.msk.bf16.vlgmr.msra.gmra.mxu2 %vm921_vm5, %v1432_v49 }
 0x787   : > { %v1371_v50 = vpop.permute.xlu1 %1370 }
 0x788   : > { %1993 = vmatmul.msk.bf16.vlgmr.msra.gmra.mxu1 %vm921_vm5, %v1371_v50 }
 0x78f   : > { %v1495_v51 = vpop.permute.xlu1 %1494 }
 0x790   : > { %v1500_v52 = vsel %vm921_vm5, %v1495_v51, 0 }
 0x791   : > { %1509 = vmatpush.bf16.xpose.msrb.mxu1 %v1500_v52 }
 0x797   : > { %v1493_v53 = vpop.permute.xlu1 %1492 }
 0x798   : > { %1997 = vmatmul.msk.bf16.vlgmr.msrb.gmra.mxu1 %vm921_vm5, %v1493_v53 }
 0x799   : > { %v1330_v54 = vpop.f32.mrf.mxu2 }
 0x79a   : > { %v1334_v55 = vsel %vm921_vm5, %v1330_v54, -inf }
 0x79b   : > { %1335 = vmax.xlane.f32.xlu1 %v1334_v55 }
 0x7a1   : > { %v1332_v56 = vpop.f32.mrf.mxu2 }
 0x7a2   : > { %v2062_v56 = vld [vmem:[#allocation11 + $0x8] sm:$0xff] }
 0x7a3   : > { %1580 = vmatpush.bf16.msrb.mxu2 %v2062_v56 }
 0x7b4   : > { %1347 = vrot.lane.b32.xlu1 %v3016_v24, %s2641_s23 }
 0x7bc   : > { %1466 = vrot.lane.b32.xlu1 %v3016_v24, %s2645_s11  ;;  %s2563_s11 = scalar_lea.hbm %s3171_s22, 16 }
 0x7f3   : > { %v1450_v57 = vpop.f32.mrf.mxu2 }
 0x7f4   : > { %v1454_v63 = vsel %vm921_vm5, %v1450_v57, -inf }
 0x7fb   : > { %v1452_v58 = vpop.f32.mrf.mxu2 }
 0x805   : > { %v1389_v59 = vpop.f32.mrf.mxu1 }
 0x806   : > { %v1393_v60 = vsel %vm921_vm5, %v1389_v59, -inf }
 0x807   : > { %1394 = vmax.xlane.f32.xlu0 %v1393_v60 }
 0x80d   : > { %v1391_v61 = vpop.f32.mrf.mxu1 }
 0x80e   : > { %v1336_v62 = vpop.xlane.xlu1 %1335 }
 0x80f   : > { %v1337_v1 = vsub.f32 %v1330_v54, %v1336_v62  ;;  %1455 = vmax.xlane.f32.xlu0 %v1454_v63  ;;  %v2228_v63 = vld [vmem:[#allocation12] ss:$0 sm:$0xff] }
 0x811   : > { %v1338_v2 = vmul.f32 1.442695, %v1337_v1 }
 0x813   : > { %2255 = vpow2.f32 %v1338_v2 }
 0x815   : > { %v1511_v3 = vpop.f32.mrf.mxu1 }
 0x816   : > { %v1515_v5 = vsel %vm921_vm5, %v1511_v3, -inf }
 0x817   : > { %1516 = vmax.xlane.f32.xlu0 %v1515_v5 }
 0x819   : > { %v2256_v6 = vpop.eup %2255 }
 0x81a   : > { %v1340_v9 = vsel %vm921_vm5, %v2256_v6, 0.0 }
 0x81d   : > { %v1513_v7 = vpop.f32.mrf.mxu1 }
 0x81f   : > { %1341 = vadd.xlane.f32.xlu0 %v1340_v9 }
 0x826   : > { %v1348_v10 = vpop.permute.xlu1 %1347 }
 0x827   : > { %v1353_v11 = vsel %vm959_vm7, %v1348_v10, 0 }
 0x828   : > { %1362 = vmatpush.bf16.msrb.mxu0 %v1353_v11 }
 0x82e   : > { %v1467_v0 = vpop.permute.xlu1 %1466 }
 0x82f   : > { %v1472_v12 = vsel %vm959_vm7, %v1467_v0, 0 }
 0x830   : > { %1481 = vmatpush.bf16.msra.mxu0 %v1472_v12  ;;  %v2064_v12 = vld [vmem:[#allocation14 + $0x8] sm:$0xff] }
 0x833   : > { %1405 = vrot.lane.b32.xlu0 %v3016_v24, %s2643_s0 }
 0x87a   : > { %v1395_v13 = vpop.xlane.xlu0 %1394 }
 0x87b   : > { %v1396_v14 = vsub.f32 %v1389_v59, %v1395_v13  ;;  %v2063_v13 = vld [vmem:[#allocation14] sm:$0xff] }
 0x87d   : > { %v1397_v15 = vmul.f32 1.442695, %v1396_v14 }
 0x87f   : > { %2257 = vpow2.f32 %v1397_v15 }
 0x882   : > { %v1456_v16 = vpop.xlane.xlu0 %1455 }
 0x883   : > { %v1457_v17 = vsub.f32 %v1450_v57, %v1456_v16  ;;  %v2061_v57 = vld [vmem:[#allocation11] sm:$0xff]  ;;  %v2071_v16 = vld [vmem:[%s3169_s20 + $0x30] sm:$0xff] }
 0x884   : > { %1581 = vmatpush.bf16.msrb.mxu2 %v2061_v57 }
 0x885   : > { %v2258_v18 = vpop.eup %2257  ;;  %v1458_v19 = vmul.f32 1.442695, %v1457_v17 }
 0x886   : > { %v1399_v20 = vsel %vm921_vm5, %v2258_v18, 0.0 }
 0x887   : > { %2259 = vpow2.f32 %v1458_v19  ;;  %1400 = vadd.xlane.f32.xlu2 %v1399_v20  ;;  %v2069_v19 = vld [vmem:[%s3169_s20 + $0x20] sm:$0xff] }
 0x88a   : > { %v1517_v21 = vpop.xlane.xlu0 %1516 }
 0x88b   : > { %v1518_v22 = vsub.f32 %v1511_v3, %v1517_v21 }
 0x88d   : > { %v2260_v23 = vpop.eup %2259  ;;  %v1519_v25 = vmul.f32 1.442695, %v1518_v22 }
 0x88e   : > { %v1460_v26 = vsel %vm921_vm5, %v2260_v23, 0.0 }
 0x88f   : > { %2261 = vpow2.f32 %v1519_v25  ;;  %1461 = vadd.xlane.f32.xlu2 %v1460_v26  ;;  %v2067_v25 = vld [vmem:[%s3169_s20 + $0x10] sm:$0xff] }
 0x892   : > { %v1342_v27 = vpop.xlane.xlu0 %1341 }
 0x893   : > { %2263 = vrcp.f32 %v1342_v27 }
 0x895   : > { %v2262_v28 = vpop.eup %2261 }
 0x896   : > { %v1521_v29 = vsel %vm921_vm5, %v2262_v28, 0.0 }
 0x897   : > { %1522 = vadd.xlane.f32.xlu0 %v1521_v29 }
 0x899   : > { %v2264_v30 = vpop.eup %2263 }
 0x89a   : > { %v1344_v31 = vmul.f32 %v2264_v30, %v2256_v6 }
 0x89c   : > { %v1345_v32 = vpack.c.bf16 %v1344_v31, %v1344_v31  ;;  %v2230_v31 = vld [vmem:[%s3166_s17] ss:$0 sm:$0xff] }
 0x89e   : > { %1992 = vmatmul.msk.bf16.vlgmr.msrb.gmra.mxu0 %vm921_vm5, %v1345_v32 }
 0x89f   : > { %1655 = vmatpush.bf16.msrb.mxu0 %v2064_v12 }
 0x8a3   : > { %1656 = vmatpush.bf16.msrb.mxu0 %v2063_v13 }
 0x8a5   : > { %v1406_v33 = vpop.permute.xlu0 %1405 }
 0x8a6   : > { %v1411_v34 = vsel %vm959_vm7, %v1406_v33, 0 }
 0x8a7   : > { %1527 = vrot.lane.b32.xlu2 %v3016_v24, %s3216_s3  ;;  %1420 = vmatpush.bf16.msra.mxu3 %v1411_v34 }
 0x8fa   : > { %v1401_v35 = vpop.xlane.xlu2 %1400 }
 0x8fb   : > { %2265 = vrcp.f32 %v1401_v35  ;;  %v2066_v35 = vld [vmem:[%s3169_s20 + $0x8] sm:$0xff] }
 0x901   : > { %v2266_v36 = vpop.eup %2265 }
 0x902   : > { %v1403_v37 = vmul.f32 %v2266_v36, %v2258_v18  ;;  %v1462_v38 = vpop.xlane.xlu2 %1461  ;;  %v2070_v18 = vld [vmem:[%s3169_s20 + $0x28] sm:$0xff]  ;;  %v2065_v36 = vld [vmem:[%s3169_s20] sm:$0xff] }
 0x903   : > { %2267 = vrcp.f32 %v1462_v38 }
 0x904   : > { %v1404_v39 = vpack.c.bf16 %v1403_v37, %v1403_v37  ;;  %v2231_v37 = vld [vmem:[#allocation15] ss:$0 sm:$0xff] }
 0x906   : > { %1994 = vmatmul.msk.bf16.vlgmr.msra.gmra.mxu3 %vm921_vm5, %v1404_v39 }
 0x909   : > { %v2268_v40 = vpop.eup %2267 }
 0x90a   : > { %v1464_v41 = vmul.f32 %v2268_v40, %v2260_v23  ;;  %v1528_v42 = vpop.permute.xlu2 %1527  ;;  %v1523_v43 = vpop.xlane.xlu0 %1522 }
 0x90b   : > { %v1533_v44 = vsel %vm959_vm7, %v1528_v42, 0  ;;  %2269 = vrcp.f32 %v1523_v43  ;;  %v2232_v43 = vld [vmem:[#allocation17] ss:$0 sm:$0xff] }
 0x90c   : > { %v1465_v45 = vpack.c.bf16 %v1464_v41, %v1464_v41  ;;  %1542 = vmatpush.bf16.msrb.mxu3 %v1533_v44 }
 0x90e   : > { %1996 = vmatmul.msk.bf16.vlgmr.msra.gmra.mxu0 %vm921_vm5, %v1465_v45 }
 0x911   : > { %v2270_v24 = vpop.eup %2269 }
 0x912   : > { %v1525_v46 = vmul.f32 %v2270_v24, %v2262_v28  ;;  %v2229_v28 = vld [vmem:[%s3165_s16] ss:$0 sm:$0xff] }
 0x914   : > { %v1526_v47 = vpack.c.bf16 %v1525_v46, %v1525_v46 }
 0x916   : > { %1998 = vmatmul.msk.bf16.vlgmr.msrb.gmra.mxu3 %vm921_vm5, %v1526_v47 }
 0x91b   : > { %v1364_v48 = vpop.f32.mrf.mxu0 }
 0x91c   : > { %1368 = vst.msk [vmem:[#allocation2] sm:$0xff] %vm921_vm5, %v1364_v48 }
 0x923   : > { %v1366_v49 = vpop.f32.mrf.mxu0 }
 0x989   : > { %v1422_v50 = vpop.f32.mrf.mxu3 }
 0x98a   : > { %1427 = vrot.lane.b32.xlu1 %v1422_v50, %s2650_s26  ;;  %s822_s26 = sand.u32 1, %s2617_s28  }
 0x98b   : > { %v1483_v51 = vpop.f32.mrf.mxu0  ;;  %s1748_s27 = scalar_lea.sflag [#allocation5], %s822_s26 }
 0x991   : > { %v1424_v52 = vpop.f32.mrf.mxu3 }
 0x992   : > { %1488 = vrot.lane.b32.xlu1 %v1483_v51, %s2652_s24  ;;  %s2050_s24 = sshll.u32 %s2789_s4, 3 }
 0x993   : > { %v1485_v53 = vpop.f32.mrf.mxu0  ;;  %s1758_s2 = scalar_lea.hbm %s3171_s22, %s2050_s24 }
 0x994   : > { %s1762_s3 = sshll.u32 %s1758_s2, 4  ;;  %s1763_s3 = int_to_ptr.hbm [resolvable:$true] %s1762_s3 }
 0x995   : > { %s2557_s23 = sshra.s32 %s1763_s3, 4  ;;  %s2558_s23 = int_to_ptr.hbm [resolvable:$true] %s2557_s23 }
 0x996   : > { %s2559_s4 = scalar_lea.hbm %s2558_s23, 8  ;;  %p2564_p3 = scmp.lt.s32.totalorder %s2558_s23, %s3171_s22 }
 0x997   : > { %p2560_p0 = scmp.ne.s32.totalorder %s2558_s23, %s2559_s4  ;;  %p2565_p4 = scmp.lt.s32.totalorder %s2563_s11, %s2559_s4 }
 0x999   : > { %v1544_v54 = vpop.f32.mrf.mxu3  ;;  %p2561_p1 = pnand %p2560_p0, %p2806_p5  ;;  %p2566_p7 = por %p2565_p4, %p2564_p3 }
 0x99a   : > { %1549 = vrot.lane.b32.xlu0 %v1544_v54, %s2651_s15  ;;  %s1944_s15 = sshll.u32 %s822_s26, 3 }
 0x99b   : > { %s824_s7 = scalar_lea.vmem [#allocation18], %s1944_s15  ;;  %p2562_p2 = pneg %p2561_p1 }
 0x99c   : > { %s1760_s30 = sshll.u32 %s824_s7, 4  ;;  %s1761_s30 = int_to_ptr.vmem [resolvable:$true] %s1760_s30 }
 0x99d   : > { %p2567_p8 = pnand %p2566_p7, %p2562_p2 }
 0x9a1   : > { %v1546_v55 = vpop.f32.mrf.mxu3 }
 0x9fc   : > { %v1428_v58 = vpop.permute.xlu1 %1427 }
 0x9fd   : > { %1430 = vst.msk [vmem:[#allocation2] sm:$0xff] %vm1038_vm8, %v1428_v58 }
 0xa04   : > { %v1489_v59 = vpop.permute.xlu1 %1488 }
 0xa05   : > { %1491 = vst.msk [vmem:[#allocation2] sm:$0xff] %vm1101_vm9, %v1489_v59 }
 0xa0c   : > { %v1550_v60 = vpop.permute.xlu0 %1549 }
 0xa0d   : > { %1552 = vst.msk [vmem:[#allocation2] sm:$0xff] %vm1164_vm10, %v1550_v60 }
 0xa14   : > { %v1553_v61 = vld [vmem:[#allocation2] sm:$0xff] }
 0xa15   : > { %v1554_v62 = vpack.c.bf16 %v1553_v61, %v1553_v61 }
 0xa17   : > { %2007 = vmatmul.msk.bf16.vlgmr.msrb.gmra.mxu2 %vm837_vm0, %v1554_v62 }
 0xa9a   : > { %v1583_v1 = vpop.f32.mrf.mxu2 }
 0xa9b   : > { %v1587_v2 = vadd.f32 %v1583_v1, %v2996_v4  ;;  %v2072_v4 = vld [vmem:[%s3169_s20 + $0x38] sm:$0xff] }
 0xa9c   : > { %1732 = vmatpush.bf16.msra.mxu1 %v2072_v4 }
 0xa9d   : > { %v3076_v3 = vadd.f32 %v2228_v63, %v1587_v2 }
 0xa9f   : > { %v1595_v5 = vsel %vm837_vm0, %v3076_v3, 0.0 }
 0xaa0   : > { %1596 = vadd.xlane.f32.xlu2 %v1595_v5  ;;  %1733 = vmatpush.bf16.msra.mxu1 %v2071_v16 }
 0xaa2   : > { %v1585_v6 = vpop.f32.mrf.mxu2 }
 0xaa4   : > { %1734 = vmatpush.bf16.msra.mxu1 %v2070_v18 }
 0xaa8   : > { %1735 = vmatpush.bf16.msra.mxu1 %v2069_v19 }
 0xb13   : > { %v1597_v7 = vpop.xlane.xlu2 %1596 }
 0xb14   : > { %v1598_v9 = vmul.f32 %v1597_v7, %v2910_v8 }
 0xb16   : > { %v1599_v10 = vsub.f32 %v3076_v3, %v1598_v9 }
 0xb18   : > { %v1600_v11 = vmul.f32 %v1599_v10, %v1599_v10 }
 0xb1a   : > { %v1601_v0 = vsel %vm837_vm0, %v1600_v11, 0.0 }
 0xb1b   : > { %1602 = vadd.xlane.f32.xlu1 %v1601_v0 }
 0xb8e   : > { %v1603_v14 = vpop.xlane.xlu1 %1602 }
 0xb8f   : > { %v1604_v15 = vmul.f32 %v1603_v14, %v2910_v8  ;;  %v2068_v8 = vld [vmem:[%s3169_s20 + $0x18] sm:$0xff] }
 0xb90   : > { %1736 = vmatpush.bf16.msra.mxu1 %v2068_v8 }
 0xb91   : > { %v1605_v17 = vadd.f32 1e-05, %v1604_v15 }
 0xb93   : > { %2271 = vrsqrt.f32 %v1605_v17  ;;  %vm1612_vm15 = vweird.f32 %v1605_v17 }
 0xb94   : > { %1737 = vmatpush.bf16.msra.mxu1 %v2067_v25 }
 0xb98   : > { %1738 = vmatpush.bf16.msra.mxu1 %v2066_v35 }
 0xb99   : > { %v2272_v20 = vpop.eup %2271 }
 0xb9a   : > { %v1607_v21 = vmul.f32 %v2272_v20, %v1605_v17  ;;  %vm1613_vm14 = vweird.f32 %v2272_v20 }
 0xb9b   : > { %vm1614_vm1 = vmor %vm1612_vm15, %vm1613_vm14 }
 0xb9c   : > { %v1608_v22 = vmul.f32 %v2272_v20, %v1607_v21  ;;  %1739 = vmatpush.bf16.msra.mxu1 %v2065_v36 }
 0xb9e   : > { %v1609_v23 = vmul.f32 0.5, %v1608_v22 }
 0xba0   : > { %v1610_v26 = vsub.f32 1.5, %v1609_v23 }
 0xba2   : > { %v1611_v27 = vmul.f32 %v2272_v20, %v1610_v26 }
 0xba4   : > { %v1615_v29 = vsel %vm1614_vm1, %v2272_v20, %v1611_v27 }
 0xba5   : > { %v1616_v30 = vmul.f32 %v1615_v29, %v1599_v10 }
 0xba7   : > { %v1620_v32 = vmul.f32 %v2229_v28, %v1616_v30 }
 0xba9   : > { %v1624_v33 = vadd.f32 %v2230_v31, %v1620_v32 }
 0xbab   : > { %v1625_v34 = vpack.c.bf16 %v1624_v33, %v1624_v33 }
 0xbad   : > { %2016 = vmatmul.msk.bf16.vlgmr.msrb.gmra.mxu0 %vm837_vm0, %v1625_v34 }
 0xc2a   : > { %v1658_v38 = vpop.f32.mrf.mxu0 }
 0xc2b   : > { %v1659_v39 = vadd.f32 %v2231_v37, %v1658_v38 }
 0xc2d   : > { %v1662_v40 = vmax.f32 %v1659_v39, 0.0 }
 0xc2f   : > { %v1663_v41 = vpack.c.bf16 %v1662_v40, %v1662_v40 }
 0xc31   : > { %1740 = vmatmul.bf16.vlgmr.msra.gmra.mxu1 %v1663_v41 }
 0xc32   : > { %v1660_v42 = vpop.f32.mrf.mxu0 }
 0xcae   : > { %v1741_v44 = vpop.f32.mrf.mxu1 }
 0xcaf   : > { %v1742_v45 = vadd.f32 %v2232_v43, %v1741_v44 }
 0xcb1   : > { %v1745_v24 = vadd.f32 %v1742_v45, %v3076_v3 }
 0xcb3   : > { %1746 = vst.msk [vmem:[%s824_s7] sm:$0xff] %vm837_vm0, %v1745_v24 }
 0xcb4   : > { %2570 = shalt.err (!%p2567_p8)
}
 0xcb5   : > { %2109 = dma.vmem_to_hbm [thread:$0]  (%p2806_p5), %s1761_s30, 128, %s1763_s3, %s1748_s27  }
 0xcb6   : > { %v1743_v46 = vpop.f32.mrf.mxu1 }
 0xcb7 PF: > { %s3218_s26 = sld [smem:[#allocation27_spill]] }
 0xcb8   : > { %s3219_s25 = sld [smem:[#allocation25_spill]] }
 0xcbd   : > { %p2161_p9 = scmp.ge.s32.totalorder %s3218_s26, 2 }
 0xcbe   : > { %s1774_s2 = sand.u32 1, %s3219_s25  }
 0xcbf   : > { %p2140_p10 = pnand %p2161_p9, %p2810_p6  ;;  %s1775_s7 = scalar_lea.sflag [#allocation5], %s1774_s2 }
 0xcc1   : > { %p2141_p11 = pneg %p2140_p10 }
 0xcc3   : > { %2608 = dma.done.wait (%p2141_p11), %s1775_s7, 128  }
 0xcc4   : > { %2610 = vsyncadd (%p2141_p11), %s1775_s7, 4294967168  ;;  %s3221_s30 = sld [smem:[#allocation28_spill]]  ;;  %s3224_s3 = smov %s2617_s28 }
 0xcc5   : > { %s3222_s23 = sld [smem:[#allocation26_spill]] }
 0xcc6   : > { %s3223_s29 = sld [smem:[#allocation29_spill]] }
 0xcca   : > { %p37_p12 = scmp.ge.s32.totalorder %s3221_s30, 4  }
 0xccb   : > { %s3225_s28 = smov %s3222_s23 }
 0xccc   :  { %39 = sbr.rel (!%p37_p12) target bundleno = 20 (0x14), region = 183 }
 0xcd1   :  { %1781 = vsyncpa [#allocation4], 1 }
 0xcd2   :  { %1783 = vsyncpa [#allocation4 + $0x1], 1 }
 0xcd3   :  { %1784 = vsyncpa [#allocation7], 1 }
 0xcd4   :  { %1785 = vsyncpa [#allocation10], 1 }
 0xcd5   :  { %1786 = vsyncpa [#allocation13], 1 }
 0xcd6   :  { %1787 = vsyncpa [#allocation16], 1 }
 0xcd7   :  { %1788 = vsyncpa [#allocation5], 1 }
 0xcd8   :  { %1790 = vsyncpa [#allocation5 + $0x1], 1 }

</bundles_post_ra>
